<compile_context>
chip_gen: v5e
topology: v5e:2x2
jax: 0.10.0
libtpu: 0.0.40
codegen_flags: <defaults>
</compile_context>

<pallas_src>
import functools

import jax
import jax.numpy as jnp
from jax.experimental import pallas as pl
from jax.experimental.pallas import tpu as pltpu

# Matches the PyTorch module's constant (2 * 3.14, intentionally not 2*pi).
TWO_PI_ISH = 2.0 * 3.14


def _round_up(a, b):
    return (a + b - 1) // b * b


def _table_index_map(i, x_ref):
    # Whole table, same block every step -> stays VMEM-resident (no re-fetch).
    del i, x_ref
    return (0, 0)


def _out_index_map(i, x_ref):
    del x_ref
    return (i, 0)


def position_embedding_kernel(x_sref, freq_ref, phase_ref, out_ref, *, T, E, LP, R):
    # x_sref   : (Npad,) int32 in SMEM (scalar prefetch) — gather indices.
    # freq_ref : (V, E) f32 VMEM-resident frequency table.
    # phase_ref: (V, E) f32 VMEM-resident precomputed phase bias
    #            (= TWO_PI_ISH * sigmoid(phase_table), hoisted out of the kernel).
    # out_ref  : (R // LP, LP * E) f32 block = R consecutive flattened rows,
    #            LP rows lane-packed per sublane (last dim is a multiple of 128).
    base = pl.program_id(0) * R
    for r in range(R):                      # static unroll -> static store offsets
        s, g = divmod(r, LP)
        idx = x_sref[base + r]                           # SMEM scalar read
        pos = ((base + r) % T).astype(jnp.float32)       # time index of this row
        freq_row = freq_ref[pl.ds(idx, 1), :]            # (1, E) gather from VMEM
        phase_row = phase_ref[pl.ds(idx, 1), :]          # (1, E)
        out_ref[s:s + 1, g * E:(g + 1) * E] = pos * freq_row + phase_row


def precompute_tables(freq_table, phase_table):
    """One-time parameter transform (hoisted out of the per-call path)."""
    phase_bias = TWO_PI_ISH * jax.nn.sigmoid(phase_table.astype(jnp.float32))
    return freq_table.astype(jnp.float32), phase_bias


def position_embedding(x, freq_table, phase_bias, *, rows_per_step=256):
    B, T = x.shape
    V, E = freq_table.shape

    # Lane-pack LP rows per output sublane so the block's last dim is a
    # multiple of 128 (lane-dense stores). Falls back to LP=1 for odd E.
    LP = 128 // E if (E < 128 and 128 % E == 0) else 1

    # Rows per grid step: multiple of 8*LP (>=8 sublanes in the output block),
    # big enough to amortize per-step overhead, clamped to the problem size.
    row_align = 8 * LP
    N = B * T
    R = min(_round_up(max(rows_per_step, row_align), row_align),
            _round_up(N, row_align))
    R_sub = R // LP

    num_steps = pl.cdiv(N, R)
    Npad = num_steps * R

    x_flat = x.reshape(N).astype(jnp.int32)
    if Npad != N:
        # Padded tail rows gather row 0 (always valid) and are sliced off after.
        x_flat = jnp.pad(x_flat, (0, Npad - N))

    # VMEM budget: two resident tables + double-buffered output block + margin.
    table_bytes = 2 * V * E * 4
    out_block_bytes = R_sub * LP * E * 4
    vmem_need = 2 * table_bytes + 2 * out_block_bytes + (1 << 20)
    vmem_limit = int(min(max(32 << 20, 2 * vmem_need), 112 << 20))
    # TODO(synk): if table_bytes > ~24 MiB (v7x budget), switch to a batched
    # manual make_async_copy HBM-gather path instead of resident tables.

    kernel = functools.partial(position_embedding_kernel, T=T, E=E, LP=LP, R=R)

    out = pl.pallas_call(
        kernel,
        out_shape=jax.ShapeDtypeStruct((num_steps * R_sub, LP * E), jnp.float32),
        grid_spec=pltpu.PrefetchScalarGridSpec(
            num_scalar_prefetch=1,
            grid=(num_steps,),
            in_specs=[
                pl.BlockSpec((V, E), _table_index_map),   # freq table (resident)
                pl.BlockSpec((V, E), _table_index_map),   # phase bias (resident)
            ],
            out_specs=pl.BlockSpec((R_sub, LP * E), _out_index_map),
        ),
        compiler_params=pltpu.CompilerParams(
            dimension_semantics=("parallel",),
            vmem_limit_bytes=vmem_limit),
    )(x_flat, freq_table, phase_bias)

    # Packed (num_steps*R_sub, LP*E) layout is exactly row-major (Npad, E):
    # the reshape below is free (no relayout), then slice off padding.
    return out.reshape(Npad, E)[:N].reshape(B, T, E)


def make_params(key, input_dim, embed_dim):
    # frequency_inits = 1 / 10000 ** (arange(E) / E), tiled over input_dim rows.
    freq_inits = 1.0 / jnp.power(
        10000.0, jnp.arange(embed_dim, dtype=jnp.float32) / embed_dim)
    freq_table = jnp.tile(freq_inits[None, :], (input_dim, 1))          # (V, E)
    # phase_matrix = rand(input_dim, embed_dim)
    phase_table = jax.random.uniform(key, (input_dim, embed_dim),
                                     dtype=jnp.float32)                 # (V, E)
    return freq_table, phase_table


def reference(x, freq_table, phase_table):
    # Pure-JAX reference of the PyTorch forward.
    phases = TWO_PI_ISH * jax.nn.sigmoid(phase_table[x])                # (B, T, E)
    T = x.shape[1]
    E = freq_table.shape[1]
    positions = jnp.broadcast_to(
        jnp.arange(T, dtype=jnp.float32)[:, None], (T, E))
    return positions * freq_table[x] + phases


if __name__ == "__main__":
    B, T = 2, 8           # batch, time_stamps
    V, E = 16, 32         # input_dim (vocab), embed_dim

    key = jax.random.PRNGKey(0)
    k_phase, k_x = jax.random.split(key)

    freq_table, phase_table = make_params(k_phase, V, E)
    x = jax.random.randint(k_x, (B, T), 0, V, dtype=jnp.int32)

    # One-time precompute (sigmoid + layout), reused across forward calls.
    freq_tab, phase_bias = precompute_tables(freq_table, phase_table)

    out = position_embedding(x, freq_tab, phase_bias)
    out = jax.block_until_ready(out)

    ref = reference(x, freq_table, phase_table)
    assert out.shape == (B, T, E)
    assert jnp.allclose(out, ref, atol=1e-5, rtol=1e-5), "mismatch vs reference"

    print("KERNEL_OK")
</pallas_src>

<mosaic_0001>
module attributes {stable_mosaic.version = 11 : i64} {
  func.func @position_embedding_kernel(%arg0: i32, %arg1: memref<32xi32, #tpu.memory_space<smem>>, %arg2: memref<16x32xf32, #tpu.memory_space<vmem>>, %arg3: memref<16x32xf32, #tpu.memory_space<vmem>>, %arg4: memref<8x128xf32, #tpu.memory_space<vmem>>) attributes {dimension_semantics = [#tpu.dimension_semantics<parallel>], iteration_bounds = array<i64: 1>, scalar_prefetch = 1 : i64, scratch_operands = 0 : i64, tpu.core_type = #tpu.core_type<tc>, window_params = [{pipeline_mode = #tpu.pipeline_mode<synchronous>, transform_indices = @transform_0, window_bounds = array<i64: 16, 32>}, {pipeline_mode = #tpu.pipeline_mode<synchronous>, transform_indices = @transform_1, window_bounds = array<i64: 16, 32>}, {transform_indices = @transform_2, window_bounds = array<i64: 8, 128>}]} {
    %c32_i32 = arith.constant 32 : i32
    %0 = arith.muli %arg0, %c32_i32 : i32
    %c0_i32 = arith.constant 0 : i32
    %1 = arith.addi %0, %c0_i32 : i32
    %2 = arith.index_cast %1 : i32 to index
    %3 = memref.load %arg1[%2] : memref<32xi32, #tpu.memory_space<smem>>
    %c0_i32_0 = arith.constant 0 : i32
    %4 = arith.addi %0, %c0_i32_0 : i32
    %c8_i32 = arith.constant 8 : i32
    %c0_i32_1 = arith.constant 0 : i32
    %5 = arith.cmpi eq, %c8_i32, %c0_i32_1 : i32
    %c1_i32 = arith.constant 1 : i32
    %6 = arith.select %5, %c1_i32, %c8_i32 : i32
    %7 = arith.remsi %4, %6 : i32
    %c0_i32_2 = arith.constant 0 : i32
    %8 = arith.cmpi ne, %7, %c0_i32_2 : i32
    %c0_i32_3 = arith.constant 0 : i32
    %9 = arith.cmpi slt, %7, %c0_i32_3 : i32
    %c0_i32_4 = arith.constant 0 : i32
    %10 = arith.cmpi slt, %6, %c0_i32_4 : i32
    %11 = arith.xori %9, %10 : i1
    %12 = arith.andi %11, %8 : i1
    %13 = arith.addi %7, %6 : i32
    %14 = arith.select %12, %13, %7 : i32
    %15 = arith.sitofp %14 : i32 to f32
    %16 = arith.index_cast %3 : i32 to index
    %c0 = arith.constant 0 : index
    %17 = vector.load %arg2[%16, %c0] : memref<16x32xf32, #tpu.memory_space<vmem>>, vector<1x32xf32>
    %18 = arith.index_cast %3 : i32 to index
    %c0_5 = arith.constant 0 : index
    %19 = vector.load %arg3[%18, %c0_5] : memref<16x32xf32, #tpu.memory_space<vmem>>, vector<1x32xf32>
    %20 = vector.broadcast %15 : f32 to vector<1x32xf32>
    %21 = arith.mulf %20, %17 : vector<1x32xf32>
    %22 = arith.addf %21, %19 : vector<1x32xf32>
    %c0_6 = arith.constant 0 : index
    %c0_7 = arith.constant 0 : index
    %23 = vector.load %arg4[%c0_6, %c0_7] : memref<8x128xf32, #tpu.memory_space<vmem>>, vector<1x32xf32>
    tpu.vector_store %arg4[%c0_6, %c0_7], %22 {strides = array<i32>} : memref<8x128xf32, #tpu.memory_space<vmem>>, vector<1x32xf32>,
    %c1_i32_8 = arith.constant 1 : i32
    %24 = arith.addi %0, %c1_i32_8 : i32
    %25 = arith.index_cast %24 : i32 to index
    %26 = memref.load %arg1[%25] : memref<32xi32, #tpu.memory_space<smem>>
    %c1_i32_9 = arith.constant 1 : i32
    %27 = arith.addi %0, %c1_i32_9 : i32
    %c8_i32_10 = arith.constant 8 : i32
    %c0_i32_11 = arith.constant 0 : i32
    %28 = arith.cmpi eq, %c8_i32_10, %c0_i32_11 : i32
    %c1_i32_12 = arith.constant 1 : i32
    %29 = arith.select %28, %c1_i32_12, %c8_i32_10 : i32
    %30 = arith.remsi %27, %29 : i32
    %c0_i32_13 = arith.constant 0 : i32
    %31 = arith.cmpi ne, %30, %c0_i32_13 : i32
    %c0_i32_14 = arith.constant 0 : i32
    %32 = arith.cmpi slt, %30, %c0_i32_14 : i32
    %c0_i32_15 = arith.constant 0 : i32
    %33 = arith.cmpi slt, %29, %c0_i32_15 : i32
    %34 = arith.xori %32, %33 : i1
    %35 = arith.andi %34, %31 : i1
    %36 = arith.addi %30, %29 : i32
    %37 = arith.select %35, %36, %30 : i32
    %38 = arith.sitofp %37 : i32 to f32
    %39 = arith.index_cast %26 : i32 to index
    %c0_16 = arith.constant 0 : index
    %40 = vector.load %arg2[%39, %c0_16] : memref<16x32xf32, #tpu.memory_space<vmem>>, vector<1x32xf32>
    %41 = arith.index_cast %26 : i32 to index
    %c0_17 = arith.constant 0 : index
    %42 = vector.load %arg3[%41, %c0_17] : memref<16x32xf32, #tpu.memory_space<vmem>>, vector<1x32xf32>
    %43 = vector.broadcast %38 : f32 to vector<1x32xf32>
    %44 = arith.mulf %43, %40 : vector<1x32xf32>
    %45 = arith.addf %44, %42 : vector<1x32xf32>
    %c0_18 = arith.constant 0 : index
    %c32 = arith.constant 32 : index
    %46 = vector.load %arg4[%c0_18, %c32] : memref<8x128xf32, #tpu.memory_space<vmem>>, vector<1x32xf32>
    tpu.vector_store %arg4[%c0_18, %c32], %45 {strides = array<i32>} : memref<8x128xf32, #tpu.memory_space<vmem>>, vector<1x32xf32>,
    %c2_i32 = arith.constant 2 : i32
    %47 = arith.addi %0, %c2_i32 : i32
    %48 = arith.index_cast %47 : i32 to index
    %49 = memref.load %arg1[%48] : memref<32xi32, #tpu.memory_space<smem>>
    %c2_i32_19 = arith.constant 2 : i32
    %50 = arith.addi %0, %c2_i32_19 : i32
    %c8_i32_20 = arith.constant 8 : i32
    %c0_i32_21 = arith.constant 0 : i32
    %51 = arith.cmpi eq, %c8_i32_20, %c0_i32_21 : i32
    %c1_i32_22 = arith.constant 1 : i32
    %52 = arith.select %51, %c1_i32_22, %c8_i32_20 : i32
    %53 = arith.remsi %50, %52 : i32
    %c0_i32_23 = arith.constant 0 : i32
    %54 = arith.cmpi ne, %53, %c0_i32_23 : i32
    %c0_i32_24 = arith.constant 0 : i32
    %55 = arith.cmpi slt, %53, %c0_i32_24 : i32
    %c0_i32_25 = arith.constant 0 : i32
    %56 = arith.cmpi slt, %52, %c0_i32_25 : i32
    %57 = arith.xori %55, %56 : i1
    %58 = arith.andi %57, %54 : i1
    %59 = arith.addi %53, %52 : i32
    %60 = arith.select %58, %59, %53 : i32
    %61 = arith.sitofp %60 : i32 to f32
    %62 = arith.index_cast %49 : i32 to index
    %c0_26 = arith.constant 0 : index
    %63 = vector.load %arg2[%62, %c0_26] : memref<16x32xf32, #tpu.memory_space<vmem>>, vector<1x32xf32>
    %64 = arith.index_cast %49 : i32 to index
    %c0_27 = arith.constant 0 : index
    %65 = vector.load %arg3[%64, %c0_27] : memref<16x32xf32, #tpu.memory_space<vmem>>, vector<1x32xf32>
    %66 = vector.broadcast %61 : f32 to vector<1x32xf32>
    %67 = arith.mulf %66, %63 : vector<1x32xf32>
    %68 = arith.addf %67, %65 : vector<1x32xf32>
    %c0_28 = arith.constant 0 : index
    %c64 = arith.constant 64 : index
    %69 = vector.load %arg4[%c0_28, %c64] : memref<8x128xf32, #tpu.memory_space<vmem>>, vector<1x32xf32>
    tpu.vector_store %arg4[%c0_28, %c64], %68 {strides = array<i32>} : memref<8x128xf32, #tpu.memory_space<vmem>>, vector<1x32xf32>,
    %c3_i32 = arith.constant 3 : i32
    %70 = arith.addi %0, %c3_i32 : i32
    %71 = arith.index_cast %70 : i32 to index
    %72 = memref.load %arg1[%71] : memref<32xi32, #tpu.memory_space<smem>>
    %c3_i32_29 = arith.constant 3 : i32
    %73 = arith.addi %0, %c3_i32_29 : i32
    %c8_i32_30 = arith.constant 8 : i32
    %c0_i32_31 = arith.constant 0 : i32
    %74 = arith.cmpi eq, %c8_i32_30, %c0_i32_31 : i32
    %c1_i32_32 = arith.constant 1 : i32
    %75 = arith.select %74, %c1_i32_32, %c8_i32_30 : i32
    %76 = arith.remsi %73, %75 : i32
    %c0_i32_33 = arith.constant 0 : i32
    %77 = arith.cmpi ne, %76, %c0_i32_33 : i32
    %c0_i32_34 = arith.constant 0 : i32
    %78 = arith.cmpi slt, %76, %c0_i32_34 : i32
    %c0_i32_35 = arith.constant 0 : i32
    %79 = arith.cmpi slt, %75, %c0_i32_35 : i32
    %80 = arith.xori %78, %79 : i1
    %81 = arith.andi %80, %77 : i1
    %82 = arith.addi %76, %75 : i32
    %83 = arith.select %81, %82, %76 : i32
    %84 = arith.sitofp %83 : i32 to f32
    %85 = arith.index_cast %72 : i32 to index
    %c0_36 = arith.constant 0 : index
    %86 = vector.load %arg2[%85, %c0_36] : memref<16x32xf32, #tpu.memory_space<vmem>>, vector<1x32xf32>
    %87 = arith.index_cast %72 : i32 to index
    %c0_37 = arith.constant 0 : index
    %88 = vector.load %arg3[%87, %c0_37] : memref<16x32xf32, #tpu.memory_space<vmem>>, vector<1x32xf32>
    %89 = vector.broadcast %84 : f32 to vector<1x32xf32>
    %90 = arith.mulf %89, %86 : vector<1x32xf32>
    %91 = arith.addf %90, %88 : vector<1x32xf32>
    %c0_38 = arith.constant 0 : index
    %c96 = arith.constant 96 : index
    %92 = vector.load %arg4[%c0_38, %c96] : memref<8x128xf32, #tpu.memory_space<vmem>>, vector<1x32xf32>
    tpu.vector_store %arg4[%c0_38, %c96], %91 {strides = array<i32>} : memref<8x128xf32, #tpu.memory_space<vmem>>, vector<1x32xf32>,
    %c4_i32 = arith.constant 4 : i32
    %93 = arith.addi %0, %c4_i32 : i32
    %94 = arith.index_cast %93 : i32 to index
    %95 = memref.load %arg1[%94] : memref<32xi32, #tpu.memory_space<smem>>
    %c4_i32_39 = arith.constant 4 : i32
    %96 = arith.addi %0, %c4_i32_39 : i32
    %c8_i32_40 = arith.constant 8 : i32
    %c0_i32_41 = arith.constant 0 : i32
    %97 = arith.cmpi eq, %c8_i32_40, %c0_i32_41 : i32
    %c1_i32_42 = arith.constant 1 : i32
    %98 = arith.select %97, %c1_i32_42, %c8_i32_40 : i32
    %99 = arith.remsi %96, %98 : i32
    %c0_i32_43 = arith.constant 0 : i32
    %100 = arith.cmpi ne, %99, %c0_i32_43 : i32
    %c0_i32_44 = arith.constant 0 : i32
    %101 = arith.cmpi slt, %99, %c0_i32_44 : i32
    %c0_i32_45 = arith.constant 0 : i32
    %102 = arith.cmpi slt, %98, %c0_i32_45 : i32
    %103 = arith.xori %101, %102 : i1
    %104 = arith.andi %103, %100 : i1
    %105 = arith.addi %99, %98 : i32
    %106 = arith.select %104, %105, %99 : i32
    %107 = arith.sitofp %106 : i32 to f32
    %108 = arith.index_cast %95 : i32 to index
    %c0_46 = arith.constant 0 : index
    %109 = vector.load %arg2[%108, %c0_46] : memref<16x32xf32, #tpu.memory_space<vmem>>, vector<1x32xf32>
    %110 = arith.index_cast %95 : i32 to index
    %c0_47 = arith.constant 0 : index
    %111 = vector.load %arg3[%110, %c0_47] : memref<16x32xf32, #tpu.memory_space<vmem>>, vector<1x32xf32>
    %112 = vector.broadcast %107 : f32 to vector<1x32xf32>
    %113 = arith.mulf %112, %109 : vector<1x32xf32>
    %114 = arith.addf %113, %111 : vector<1x32xf32>
    %c1 = arith.constant 1 : index
    %c0_48 = arith.constant 0 : index
    %115 = vector.load %arg4[%c1, %c0_48] : memref<8x128xf32, #tpu.memory_space<vmem>>, vector<1x32xf32>
    tpu.vector_store %arg4[%c1, %c0_48], %114 {strides = array<i32>} : memref<8x128xf32, #tpu.memory_space<vmem>>, vector<1x32xf32>,
    %c5_i32 = arith.constant 5 : i32
    %116 = arith.addi %0, %c5_i32 : i32
    %117 = arith.index_cast %116 : i32 to index
    %118 = memref.load %arg1[%117] : memref<32xi32, #tpu.memory_space<smem>>
    %c5_i32_49 = arith.constant 5 : i32
    %119 = arith.addi %0, %c5_i32_49 : i32
    %c8_i32_50 = arith.constant 8 : i32
    %c0_i32_51 = arith.constant 0 : i32
    %120 = arith.cmpi eq, %c8_i32_50, %c0_i32_51 : i32
    %c1_i32_52 = arith.constant 1 : i32
    %121 = arith.select %120, %c1_i32_52, %c8_i32_50 : i32
    %122 = arith.remsi %119, %121 : i32
    %c0_i32_53 = arith.constant 0 : i32
    %123 = arith.cmpi ne, %122, %c0_i32_53 : i32
    %c0_i32_54 = arith.constant 0 : i32
    %124 = arith.cmpi slt, %122, %c0_i32_54 : i32
    %c0_i32_55 = arith.constant 0 : i32
    %125 = arith.cmpi slt, %121, %c0_i32_55 : i32
    %126 = arith.xori %124, %125 : i1
    %127 = arith.andi %126, %123 : i1
    %128 = arith.addi %122, %121 : i32
    %129 = arith.select %127, %128, %122 : i32
    %130 = arith.sitofp %129 : i32 to f32
    %131 = arith.index_cast %118 : i32 to index
    %c0_56 = arith.constant 0 : index
    %132 = vector.load %arg2[%131, %c0_56] : memref<16x32xf32, #tpu.memory_space<vmem>>, vector<1x32xf32>
    %133 = arith.index_cast %118 : i32 to index
    %c0_57 = arith.constant 0 : index
    %134 = vector.load %arg3[%133, %c0_57] : memref<16x32xf32, #tpu.memory_space<vmem>>, vector<1x32xf32>
    %135 = vector.broadcast %130 : f32 to vector<1x32xf32>
    %136 = arith.mulf %135, %132 : vector<1x32xf32>
    %137 = arith.addf %136, %134 : vector<1x32xf32>
    %c1_58 = arith.constant 1 : index
    %c32_59 = arith.constant 32 : index
    %138 = vector.load %arg4[%c1_58, %c32_59] : memref<8x128xf32, #tpu.memory_space<vmem>>, vector<1x32xf32>
    tpu.vector_store %arg4[%c1_58, %c32_59], %137 {strides = array<i32>} : memref<8x128xf32, #tpu.memory_space<vmem>>, vector<1x32xf32>,
    %c6_i32 = arith.constant 6 : i32
    %139 = arith.addi %0, %c6_i32 : i32
    %140 = arith.index_cast %139 : i32 to index
    %141 = memref.load %arg1[%140] : memref<32xi32, #tpu.memory_space<smem>>
    %c6_i32_60 = arith.constant 6 : i32
    %142 = arith.addi %0, %c6_i32_60 : i32
    %c8_i32_61 = arith.constant 8 : i32
    %c0_i32_62 = arith.constant 0 : i32
    %143 = arith.cmpi eq, %c8_i32_61, %c0_i32_62 : i32
    %c1_i32_63 = arith.constant 1 : i32
    %144 = arith.select %143, %c1_i32_63, %c8_i32_61 : i32
    %145 = arith.remsi %142, %144 : i32
    %c0_i32_64 = arith.constant 0 : i32
    %146 = arith.cmpi ne, %145, %c0_i32_64 : i32
    %c0_i32_65 = arith.constant 0 : i32
    %147 = arith.cmpi slt, %145, %c0_i32_65 : i32
    %c0_i32_66 = arith.constant 0 : i32
    %148 = arith.cmpi slt, %144, %c0_i32_66 : i32
    %149 = arith.xori %147, %148 : i1
    %150 = arith.andi %149, %146 : i1
    %151 = arith.addi %145, %144 : i32
    %152 = arith.select %150, %151, %145 : i32
    %153 = arith.sitofp %152 : i32 to f32
    %154 = arith.index_cast %141 : i32 to index
    %c0_67 = arith.constant 0 : index
    %155 = vector.load %arg2[%154, %c0_67] : memref<16x32xf32, #tpu.memory_space<vmem>>, vector<1x32xf32>
    %156 = arith.index_cast %141 : i32 to index
    %c0_68 = arith.constant 0 : index
    %157 = vector.load %arg3[%156, %c0_68] : memref<16x32xf32, #tpu.memory_space<vmem>>, vector<1x32xf32>
    %158 = vector.broadcast %153 : f32 to vector<1x32xf32>
    %159 = arith.mulf %158, %155 : vector<1x32xf32>
    %160 = arith.addf %159, %157 : vector<1x32xf32>
    %c1_69 = arith.constant 1 : index
    %c64_70 = arith.constant 64 : index
    %161 = vector.load %arg4[%c1_69, %c64_70] : memref<8x128xf32, #tpu.memory_space<vmem>>, vector<1x32xf32>
    tpu.vector_store %arg4[%c1_69, %c64_70], %160 {strides = array<i32>} : memref<8x128xf32, #tpu.memory_space<vmem>>, vector<1x32xf32>,
    %c7_i32 = arith.constant 7 : i32
    %162 = arith.addi %0, %c7_i32 : i32
    %163 = arith.index_cast %162 : i32 to index
    %164 = memref.load %arg1[%163] : memref<32xi32, #tpu.memory_space<smem>>
    %c7_i32_71 = arith.constant 7 : i32
    %165 = arith.addi %0, %c7_i32_71 : i32
    %c8_i32_72 = arith.constant 8 : i32
    %c0_i32_73 = arith.constant 0 : i32
    %166 = arith.cmpi eq, %c8_i32_72, %c0_i32_73 : i32
    %c1_i32_74 = arith.constant 1 : i32
    %167 = arith.select %166, %c1_i32_74, %c8_i32_72 : i32
    %168 = arith.remsi %165, %167 : i32
    %c0_i32_75 = arith.constant 0 : i32
    %169 = arith.cmpi ne, %168, %c0_i32_75 : i32
    %c0_i32_76 = arith.constant 0 : i32
    %170 = arith.cmpi slt, %168, %c0_i32_76 : i32
    %c0_i32_77 = arith.constant 0 : i32
    %171 = arith.cmpi slt, %167, %c0_i32_77 : i32
    %172 = arith.xori %170, %171 : i1
    %173 = arith.andi %172, %169 : i1
    %174 = arith.addi %168, %167 : i32
    %175 = arith.select %173, %174, %168 : i32
    %176 = arith.sitofp %175 : i32 to f32
    %177 = arith.index_cast %164 : i32 to index
    %c0_78 = arith.constant 0 : index
    %178 = vector.load %arg2[%177, %c0_78] : memref<16x32xf32, #tpu.memory_space<vmem>>, vector<1x32xf32>
    %179 = arith.index_cast %164 : i32 to index
    %c0_79 = arith.constant 0 : index
    %180 = vector.load %arg3[%179, %c0_79] : memref<16x32xf32, #tpu.memory_space<vmem>>, vector<1x32xf32>
    %181 = vector.broadcast %176 : f32 to vector<1x32xf32>
    %182 = arith.mulf %181, %178 : vector<1x32xf32>
    %183 = arith.addf %182, %180 : vector<1x32xf32>
    %c1_80 = arith.constant 1 : index
    %c96_81 = arith.constant 96 : index
    %184 = vector.load %arg4[%c1_80, %c96_81] : memref<8x128xf32, #tpu.memory_space<vmem>>, vector<1x32xf32>
    tpu.vector_store %arg4[%c1_80, %c96_81], %183 {strides = array<i32>} : memref<8x128xf32, #tpu.memory_space<vmem>>, vector<1x32xf32>,
    %c8_i32_82 = arith.constant 8 : i32
    %185 = arith.addi %0, %c8_i32_82 : i32
    %186 = arith.index_cast %185 : i32 to index
    %187 = memref.load %arg1[%186] : memref<32xi32, #tpu.memory_space<smem>>
    %c8_i32_83 = arith.constant 8 : i32
    %188 = arith.addi %0, %c8_i32_83 : i32
    %c8_i32_84 = arith.constant 8 : i32
    %c0_i32_85 = arith.constant 0 : i32
    %189 = arith.cmpi eq, %c8_i32_84, %c0_i32_85 : i32
    %c1_i32_86 = arith.constant 1 : i32
    %190 = arith.select %189, %c1_i32_86, %c8_i32_84 : i32
    %191 = arith.remsi %188, %190 : i32
    %c0_i32_87 = arith.constant 0 : i32
    %192 = arith.cmpi ne, %191, %c0_i32_87 : i32
    %c0_i32_88 = arith.constant 0 : i32
    %193 = arith.cmpi slt, %191, %c0_i32_88 : i32
    %c0_i32_89 = arith.constant 0 : i32
    %194 = arith.cmpi slt, %190, %c0_i32_89 : i32
    %195 = arith.xori %193, %194 : i1
    %196 = arith.andi %195, %192 : i1
    %197 = arith.addi %191, %190 : i32
    %198 = arith.select %196, %197, %191 : i32
    %199 = arith.sitofp %198 : i32 to f32
    %200 = arith.index_cast %187 : i32 to index
    %c0_90 = arith.constant 0 : index
    %201 = vector.load %arg2[%200, %c0_90] : memref<16x32xf32, #tpu.memory_space<vmem>>, vector<1x32xf32>
    %202 = arith.index_cast %187 : i32 to index
    %c0_91 = arith.constant 0 : index
    %203 = vector.load %arg3[%202, %c0_91] : memref<16x32xf32, #tpu.memory_space<vmem>>, vector<1x32xf32>
    %204 = vector.broadcast %199 : f32 to vector<1x32xf32>
    %205 = arith.mulf %204, %201 : vector<1x32xf32>
    %206 = arith.addf %205, %203 : vector<1x32xf32>
    %c2 = arith.constant 2 : index
    %c0_92 = arith.constant 0 : index
    %207 = vector.load %arg4[%c2, %c0_92] : memref<8x128xf32, #tpu.memory_space<vmem>>, vector<1x32xf32>
    tpu.vector_store %arg4[%c2, %c0_92], %206 {strides = array<i32>} : memref<8x128xf32, #tpu.memory_space<vmem>>, vector<1x32xf32>,
    %c9_i32 = arith.constant 9 : i32
    %208 = arith.addi %0, %c9_i32 : i32
    %209 = arith.index_cast %208 : i32 to index
    %210 = memref.load %arg1[%209] : memref<32xi32, #tpu.memory_space<smem>>
    %c9_i32_93 = arith.constant 9 : i32
    %211 = arith.addi %0, %c9_i32_93 : i32
    %c8_i32_94 = arith.constant 8 : i32
    %c0_i32_95 = arith.constant 0 : i32
    %212 = arith.cmpi eq, %c8_i32_94, %c0_i32_95 : i32
    %c1_i32_96 = arith.constant 1 : i32
    %213 = arith.select %212, %c1_i32_96, %c8_i32_94 : i32
    %214 = arith.remsi %211, %213 : i32
    %c0_i32_97 = arith.constant 0 : i32
    %215 = arith.cmpi ne, %214, %c0_i32_97 : i32
    %c0_i32_98 = arith.constant 0 : i32
    %216 = arith.cmpi slt, %214, %c0_i32_98 : i32
    %c0_i32_99 = arith.constant 0 : i32
    %217 = arith.cmpi slt, %213, %c0_i32_99 : i32
    %218 = arith.xori %216, %217 : i1
    %219 = arith.andi %218, %215 : i1
    %220 = arith.addi %214, %213 : i32
    %221 = arith.select %219, %220, %214 : i32
    %222 = arith.sitofp %221 : i32 to f32
    %223 = arith.index_cast %210 : i32 to index
    %c0_100 = arith.constant 0 : index
    %224 = vector.load %arg2[%223, %c0_100] : memref<16x32xf32, #tpu.memory_space<vmem>>, vector<1x32xf32>
    %225 = arith.index_cast %210 : i32 to index
    %c0_101 = arith.constant 0 : index
    %226 = vector.load %arg3[%225, %c0_101] : memref<16x32xf32, #tpu.memory_space<vmem>>, vector<1x32xf32>
    %227 = vector.broadcast %222 : f32 to vector<1x32xf32>
    %228 = arith.mulf %227, %224 : vector<1x32xf32>
    %229 = arith.addf %228, %226 : vector<1x32xf32>
    %c2_102 = arith.constant 2 : index
    %c32_103 = arith.constant 32 : index
    %230 = vector.load %arg4[%c2_102, %c32_103] : memref<8x128xf32, #tpu.memory_space<vmem>>, vector<1x32xf32>
    tpu.vector_store %arg4[%c2_102, %c32_103], %229 {strides = array<i32>} : memref<8x128xf32, #tpu.memory_space<vmem>>, vector<1x32xf32>,
    %c10_i32 = arith.constant 10 : i32
    %231 = arith.addi %0, %c10_i32 : i32
    %232 = arith.index_cast %231 : i32 to index
    %233 = memref.load %arg1[%232] : memref<32xi32, #tpu.memory_space<smem>>
    %c10_i32_104 = arith.constant 10 : i32
    %234 = arith.addi %0, %c10_i32_104 : i32
    %c8_i32_105 = arith.constant 8 : i32
    %c0_i32_106 = arith.constant 0 : i32
    %235 = arith.cmpi eq, %c8_i32_105, %c0_i32_106 : i32
    %c1_i32_107 = arith.constant 1 : i32
    %236 = arith.select %235, %c1_i32_107, %c8_i32_105 : i32
    %237 = arith.remsi %234, %236 : i32
    %c0_i32_108 = arith.constant 0 : i32
    %238 = arith.cmpi ne, %237, %c0_i32_108 : i32
    %c0_i32_109 = arith.constant 0 : i32
    %239 = arith.cmpi slt, %237, %c0_i32_109 : i32
    %c0_i32_110 = arith.constant 0 : i32
    %240 = arith.cmpi slt, %236, %c0_i32_110 : i32
    %241 = arith.xori %239, %240 : i1
    %242 = arith.andi %241, %238 : i1
    %243 = arith.addi %237, %236 : i32
    %244 = arith.select %242, %243, %237 : i32
    %245 = arith.sitofp %244 : i32 to f32
    %246 = arith.index_cast %233 : i32 to index
    %c0_111 = arith.constant 0 : index
    %247 = vector.load %arg2[%246, %c0_111] : memref<16x32xf32, #tpu.memory_space<vmem>>, vector<1x32xf32>
    %248 = arith.index_cast %233 : i32 to index
    %c0_112 = arith.constant 0 : index
    %249 = vector.load %arg3[%248, %c0_112] : memref<16x32xf32, #tpu.memory_space<vmem>>, vector<1x32xf32>
    %250 = vector.broadcast %245 : f32 to vector<1x32xf32>
    %251 = arith.mulf %250, %247 : vector<1x32xf32>
    %252 = arith.addf %251, %249 : vector<1x32xf32>
    %c2_113 = arith.constant 2 : index
    %c64_114 = arith.constant 64 : index
    %253 = vector.load %arg4[%c2_113, %c64_114] : memref<8x128xf32, #tpu.memory_space<vmem>>, vector<1x32xf32>
    tpu.vector_store %arg4[%c2_113, %c64_114], %252 {strides = array<i32>} : memref<8x128xf32, #tpu.memory_space<vmem>>, vector<1x32xf32>,
    %c11_i32 = arith.constant 11 : i32
    %254 = arith.addi %0, %c11_i32 : i32
    %255 = arith.index_cast %254 : i32 to index
    %256 = memref.load %arg1[%255] : memref<32xi32, #tpu.memory_space<smem>>
    %c11_i32_115 = arith.constant 11 : i32
    %257 = arith.addi %0, %c11_i32_115 : i32
    %c8_i32_116 = arith.constant 8 : i32
    %c0_i32_117 = arith.constant 0 : i32
    %258 = arith.cmpi eq, %c8_i32_116, %c0_i32_117 : i32
    %c1_i32_118 = arith.constant 1 : i32
    %259 = arith.select %258, %c1_i32_118, %c8_i32_116 : i32
    %260 = arith.remsi %257, %259 : i32
    %c0_i32_119 = arith.constant 0 : i32
    %261 = arith.cmpi ne, %260, %c0_i32_119 : i32
    %c0_i32_120 = arith.constant 0 : i32
    %262 = arith.cmpi slt, %260, %c0_i32_120 : i32
    %c0_i32_121 = arith.constant 0 : i32
    %263 = arith.cmpi slt, %259, %c0_i32_121 : i32
    %264 = arith.xori %262, %263 : i1
    %265 = arith.andi %264, %261 : i1
    %266 = arith.addi %260, %259 : i32
    %267 = arith.select %265, %266, %260 : i32
    %268 = arith.sitofp %267 : i32 to f32
    %269 = arith.index_cast %256 : i32 to index
    %c0_122 = arith.constant 0 : index
    %270 = vector.load %arg2[%269, %c0_122] : memref<16x32xf32, #tpu.memory_space<vmem>>, vector<1x32xf32>
    %271 = arith.index_cast %256 : i32 to index
    %c0_123 = arith.constant 0 : index
    %272 = vector.load %arg3[%271, %c0_123] : memref<16x32xf32, #tpu.memory_space<vmem>>, vector<1x32xf32>
    %273 = vector.broadcast %268 : f32 to vector<1x32xf32>
    %274 = arith.mulf %273, %270 : vector<1x32xf32>
    %275 = arith.addf %274, %272 : vector<1x32xf32>
    %c2_124 = arith.constant 2 : index
    %c96_125 = arith.constant 96 : index
    %276 = vector.load %arg4[%c2_124, %c96_125] : memref<8x128xf32, #tpu.memory_space<vmem>>, vector<1x32xf32>
    tpu.vector_store %arg4[%c2_124, %c96_125], %275 {strides = array<i32>} : memref<8x128xf32, #tpu.memory_space<vmem>>, vector<1x32xf32>,
    %c12_i32 = arith.constant 12 : i32
    %277 = arith.addi %0, %c12_i32 : i32
    %278 = arith.index_cast %277 : i32 to index
    %279 = memref.load %arg1[%278] : memref<32xi32, #tpu.memory_space<smem>>
    %c12_i32_126 = arith.constant 12 : i32
    %280 = arith.addi %0, %c12_i32_126 : i32
    %c8_i32_127 = arith.constant 8 : i32
    %c0_i32_128 = arith.constant 0 : i32
    %281 = arith.cmpi eq, %c8_i32_127, %c0_i32_128 : i32
    %c1_i32_129 = arith.constant 1 : i32
    %282 = arith.select %281, %c1_i32_129, %c8_i32_127 : i32
    %283 = arith.remsi %280, %282 : i32
    %c0_i32_130 = arith.constant 0 : i32
    %284 = arith.cmpi ne, %283, %c0_i32_130 : i32
    %c0_i32_131 = arith.constant 0 : i32
    %285 = arith.cmpi slt, %283, %c0_i32_131 : i32
    %c0_i32_132 = arith.constant 0 : i32
    %286 = arith.cmpi slt, %282, %c0_i32_132 : i32
    %287 = arith.xori %285, %286 : i1
    %288 = arith.andi %287, %284 : i1
    %289 = arith.addi %283, %282 : i32
    %290 = arith.select %288, %289, %283 : i32
    %291 = arith.sitofp %290 : i32 to f32
    %292 = arith.index_cast %279 : i32 to index
    %c0_133 = arith.constant 0 : index
    %293 = vector.load %arg2[%292, %c0_133] : memref<16x32xf32, #tpu.memory_space<vmem>>, vector<1x32xf32>
    %294 = arith.index_cast %279 : i32 to index
    %c0_134 = arith.constant 0 : index
    %295 = vector.load %arg3[%294, %c0_134] : memref<16x32xf32, #tpu.memory_space<vmem>>, vector<1x32xf32>
    %296 = vector.broadcast %291 : f32 to vector<1x32xf32>
    %297 = arith.mulf %296, %293 : vector<1x32xf32>
    %298 = arith.addf %297, %295 : vector<1x32xf32>
    %c3 = arith.constant 3 : index
    %c0_135 = arith.constant 0 : index
    %299 = vector.load %arg4[%c3, %c0_135] : memref<8x128xf32, #tpu.memory_space<vmem>>, vector<1x32xf32>
    tpu.vector_store %arg4[%c3, %c0_135], %298 {strides = array<i32>} : memref<8x128xf32, #tpu.memory_space<vmem>>, vector<1x32xf32>,
    %c13_i32 = arith.constant 13 : i32
    %300 = arith.addi %0, %c13_i32 : i32
    %301 = arith.index_cast %300 : i32 to index
    %302 = memref.load %arg1[%301] : memref<32xi32, #tpu.memory_space<smem>>
    %c13_i32_136 = arith.constant 13 : i32
    %303 = arith.addi %0, %c13_i32_136 : i32
    %c8_i32_137 = arith.constant 8 : i32
    %c0_i32_138 = arith.constant 0 : i32
    %304 = arith.cmpi eq, %c8_i32_137, %c0_i32_138 : i32
    %c1_i32_139 = arith.constant 1 : i32
    %305 = arith.select %304, %c1_i32_139, %c8_i32_137 : i32
    %306 = arith.remsi %303, %305 : i32
    %c0_i32_140 = arith.constant 0 : i32
    %307 = arith.cmpi ne, %306, %c0_i32_140 : i32
    %c0_i32_141 = arith.constant 0 : i32
    %308 = arith.cmpi slt, %306, %c0_i32_141 : i32
    %c0_i32_142 = arith.constant 0 : i32
    %309 = arith.cmpi slt, %305, %c0_i32_142 : i32
    %310 = arith.xori %308, %309 : i1
    %311 = arith.andi %310, %307 : i1
    %312 = arith.addi %306, %305 : i32
    %313 = arith.select %311, %312, %306 : i32
    %314 = arith.sitofp %313 : i32 to f32
    %315 = arith.index_cast %302 : i32 to index
    %c0_143 = arith.constant 0 : index
    %316 = vector.load %arg2[%315, %c0_143] : memref<16x32xf32, #tpu.memory_space<vmem>>, vector<1x32xf32>
    %317 = arith.index_cast %302 : i32 to index
    %c0_144 = arith.constant 0 : index
    %318 = vector.load %arg3[%317, %c0_144] : memref<16x32xf32, #tpu.memory_space<vmem>>, vector<1x32xf32>
    %319 = vector.broadcast %314 : f32 to vector<1x32xf32>
    %320 = arith.mulf %319, %316 : vector<1x32xf32>
    %321 = arith.addf %320, %318 : vector<1x32xf32>
    %c3_145 = arith.constant 3 : index
    %c32_146 = arith.constant 32 : index
    %322 = vector.load %arg4[%c3_145, %c32_146] : memref<8x128xf32, #tpu.memory_space<vmem>>, vector<1x32xf32>
    tpu.vector_store %arg4[%c3_145, %c32_146], %321 {strides = array<i32>} : memref<8x128xf32, #tpu.memory_space<vmem>>, vector<1x32xf32>,
    %c14_i32 = arith.constant 14 : i32
    %323 = arith.addi %0, %c14_i32 : i32
    %324 = arith.index_cast %323 : i32 to index
    %325 = memref.load %arg1[%324] : memref<32xi32, #tpu.memory_space<smem>>
    %c14_i32_147 = arith.constant 14 : i32
    %326 = arith.addi %0, %c14_i32_147 : i32
    %c8_i32_148 = arith.constant 8 : i32
    %c0_i32_149 = arith.constant 0 : i32
    %327 = arith.cmpi eq, %c8_i32_148, %c0_i32_149 : i32
    %c1_i32_150 = arith.constant 1 : i32
    %328 = arith.select %327, %c1_i32_150, %c8_i32_148 : i32
    %329 = arith.remsi %326, %328 : i32
    %c0_i32_151 = arith.constant 0 : i32
    %330 = arith.cmpi ne, %329, %c0_i32_151 : i32
    %c0_i32_152 = arith.constant 0 : i32
    %331 = arith.cmpi slt, %329, %c0_i32_152 : i32
    %c0_i32_153 = arith.constant 0 : i32
    %332 = arith.cmpi slt, %328, %c0_i32_153 : i32
    %333 = arith.xori %331, %332 : i1
    %334 = arith.andi %333, %330 : i1
    %335 = arith.addi %329, %328 : i32
    %336 = arith.select %334, %335, %329 : i32
    %337 = arith.sitofp %336 : i32 to f32
    %338 = arith.index_cast %325 : i32 to index
    %c0_154 = arith.constant 0 : index
    %339 = vector.load %arg2[%338, %c0_154] : memref<16x32xf32, #tpu.memory_space<vmem>>, vector<1x32xf32>
    %340 = arith.index_cast %325 : i32 to index
    %c0_155 = arith.constant 0 : index
    %341 = vector.load %arg3[%340, %c0_155] : memref<16x32xf32, #tpu.memory_space<vmem>>, vector<1x32xf32>
    %342 = vector.broadcast %337 : f32 to vector<1x32xf32>
    %343 = arith.mulf %342, %339 : vector<1x32xf32>
    %344 = arith.addf %343, %341 : vector<1x32xf32>
    %c3_156 = arith.constant 3 : index
    %c64_157 = arith.constant 64 : index
    %345 = vector.load %arg4[%c3_156, %c64_157] : memref<8x128xf32, #tpu.memory_space<vmem>>, vector<1x32xf32>
    tpu.vector_store %arg4[%c3_156, %c64_157], %344 {strides = array<i32>} : memref<8x128xf32, #tpu.memory_space<vmem>>, vector<1x32xf32>,
    %c15_i32 = arith.constant 15 : i32
    %346 = arith.addi %0, %c15_i32 : i32
    %347 = arith.index_cast %346 : i32 to index
    %348 = memref.load %arg1[%347] : memref<32xi32, #tpu.memory_space<smem>>
    %c15_i32_158 = arith.constant 15 : i32
    %349 = arith.addi %0, %c15_i32_158 : i32
    %c8_i32_159 = arith.constant 8 : i32
    %c0_i32_160 = arith.constant 0 : i32
    %350 = arith.cmpi eq, %c8_i32_159, %c0_i32_160 : i32
    %c1_i32_161 = arith.constant 1 : i32
    %351 = arith.select %350, %c1_i32_161, %c8_i32_159 : i32
    %352 = arith.remsi %349, %351 : i32
    %c0_i32_162 = arith.constant 0 : i32
    %353 = arith.cmpi ne, %352, %c0_i32_162 : i32
    %c0_i32_163 = arith.constant 0 : i32
    %354 = arith.cmpi slt, %352, %c0_i32_163 : i32
    %c0_i32_164 = arith.constant 0 : i32
    %355 = arith.cmpi slt, %351, %c0_i32_164 : i32
    %356 = arith.xori %354, %355 : i1
    %357 = arith.andi %356, %353 : i1
    %358 = arith.addi %352, %351 : i32
    %359 = arith.select %357, %358, %352 : i32
    %360 = arith.sitofp %359 : i32 to f32
    %361 = arith.index_cast %348 : i32 to index
    %c0_165 = arith.constant 0 : index
    %362 = vector.load %arg2[%361, %c0_165] : memref<16x32xf32, #tpu.memory_space<vmem>>, vector<1x32xf32>
    %363 = arith.index_cast %348 : i32 to index
    %c0_166 = arith.constant 0 : index
    %364 = vector.load %arg3[%363, %c0_166] : memref<16x32xf32, #tpu.memory_space<vmem>>, vector<1x32xf32>
    %365 = vector.broadcast %360 : f32 to vector<1x32xf32>
    %366 = arith.mulf %365, %362 : vector<1x32xf32>
    %367 = arith.addf %366, %364 : vector<1x32xf32>
    %c3_167 = arith.constant 3 : index
    %c96_168 = arith.constant 96 : index
    %368 = vector.load %arg4[%c3_167, %c96_168] : memref<8x128xf32, #tpu.memory_space<vmem>>, vector<1x32xf32>
    tpu.vector_store %arg4[%c3_167, %c96_168], %367 {strides = array<i32>} : memref<8x128xf32, #tpu.memory_space<vmem>>, vector<1x32xf32>,
    %c16_i32 = arith.constant 16 : i32
    %369 = arith.addi %0, %c16_i32 : i32
    %370 = arith.index_cast %369 : i32 to index
    %371 = memref.load %arg1[%370] : memref<32xi32, #tpu.memory_space<smem>>
    %c16_i32_169 = arith.constant 16 : i32
    %372 = arith.addi %0, %c16_i32_169 : i32
    %c8_i32_170 = arith.constant 8 : i32
    %c0_i32_171 = arith.constant 0 : i32
    %373 = arith.cmpi eq, %c8_i32_170, %c0_i32_171 : i32
    %c1_i32_172 = arith.constant 1 : i32
    %374 = arith.select %373, %c1_i32_172, %c8_i32_170 : i32
    %375 = arith.remsi %372, %374 : i32
    %c0_i32_173 = arith.constant 0 : i32
    %376 = arith.cmpi ne, %375, %c0_i32_173 : i32
    %c0_i32_174 = arith.constant 0 : i32
    %377 = arith.cmpi slt, %375, %c0_i32_174 : i32
    %c0_i32_175 = arith.constant 0 : i32
    %378 = arith.cmpi slt, %374, %c0_i32_175 : i32
    %379 = arith.xori %377, %378 : i1
    %380 = arith.andi %379, %376 : i1
    %381 = arith.addi %375, %374 : i32
    %382 = arith.select %380, %381, %375 : i32
    %383 = arith.sitofp %382 : i32 to f32
    %384 = arith.index_cast %371 : i32 to index
    %c0_176 = arith.constant 0 : index
    %385 = vector.load %arg2[%384, %c0_176] : memref<16x32xf32, #tpu.memory_space<vmem>>, vector<1x32xf32>
    %386 = arith.index_cast %371 : i32 to index
    %c0_177 = arith.constant 0 : index
    %387 = vector.load %arg3[%386, %c0_177] : memref<16x32xf32, #tpu.memory_space<vmem>>, vector<1x32xf32>
    %388 = vector.broadcast %383 : f32 to vector<1x32xf32>
    %389 = arith.mulf %388, %385 : vector<1x32xf32>
    %390 = arith.addf %389, %387 : vector<1x32xf32>
    %c4 = arith.constant 4 : index
    %c0_178 = arith.constant 0 : index
    %391 = vector.load %arg4[%c4, %c0_178] : memref<8x128xf32, #tpu.memory_space<vmem>>, vector<1x32xf32>
    tpu.vector_store %arg4[%c4, %c0_178], %390 {strides = array<i32>} : memref<8x128xf32, #tpu.memory_space<vmem>>, vector<1x32xf32>,
    %c17_i32 = arith.constant 17 : i32
    %392 = arith.addi %0, %c17_i32 : i32
    %393 = arith.index_cast %392 : i32 to index
    %394 = memref.load %arg1[%393] : memref<32xi32, #tpu.memory_space<smem>>
    %c17_i32_179 = arith.constant 17 : i32
    %395 = arith.addi %0, %c17_i32_179 : i32
    %c8_i32_180 = arith.constant 8 : i32
    %c0_i32_181 = arith.constant 0 : i32
    %396 = arith.cmpi eq, %c8_i32_180, %c0_i32_181 : i32
    %c1_i32_182 = arith.constant 1 : i32
    %397 = arith.select %396, %c1_i32_182, %c8_i32_180 : i32
    %398 = arith.remsi %395, %397 : i32
    %c0_i32_183 = arith.constant 0 : i32
    %399 = arith.cmpi ne, %398, %c0_i32_183 : i32
    %c0_i32_184 = arith.constant 0 : i32
    %400 = arith.cmpi slt, %398, %c0_i32_184 : i32
    %c0_i32_185 = arith.constant 0 : i32
    %401 = arith.cmpi slt, %397, %c0_i32_185 : i32
    %402 = arith.xori %400, %401 : i1
    %403 = arith.andi %402, %399 : i1
    %404 = arith.addi %398, %397 : i32
    %405 = arith.select %403, %404, %398 : i32
    %406 = arith.sitofp %405 : i32 to f32
    %407 = arith.index_cast %394 : i32 to index
    %c0_186 = arith.constant 0 : index
    %408 = vector.load %arg2[%407, %c0_186] : memref<16x32xf32, #tpu.memory_space<vmem>>, vector<1x32xf32>
    %409 = arith.index_cast %394 : i32 to index
    %c0_187 = arith.constant 0 : index
    %410 = vector.load %arg3[%409, %c0_187] : memref<16x32xf32, #tpu.memory_space<vmem>>, vector<1x32xf32>
    %411 = vector.broadcast %406 : f32 to vector<1x32xf32>
    %412 = arith.mulf %411, %408 : vector<1x32xf32>
    %413 = arith.addf %412, %410 : vector<1x32xf32>
    %c4_188 = arith.constant 4 : index
    %c32_189 = arith.constant 32 : index
    %414 = vector.load %arg4[%c4_188, %c32_189] : memref<8x128xf32, #tpu.memory_space<vmem>>, vector<1x32xf32>
    tpu.vector_store %arg4[%c4_188, %c32_189], %413 {strides = array<i32>} : memref<8x128xf32, #tpu.memory_space<vmem>>, vector<1x32xf32>,
    %c18_i32 = arith.constant 18 : i32
    %415 = arith.addi %0, %c18_i32 : i32
    %416 = arith.index_cast %415 : i32 to index
    %417 = memref.load %arg1[%416] : memref<32xi32, #tpu.memory_space<smem>>
    %c18_i32_190 = arith.constant 18 : i32
    %418 = arith.addi %0, %c18_i32_190 : i32
    %c8_i32_191 = arith.constant 8 : i32
    %c0_i32_192 = arith.constant 0 : i32
    %419 = arith.cmpi eq, %c8_i32_191, %c0_i32_192 : i32
    %c1_i32_193 = arith.constant 1 : i32
    %420 = arith.select %419, %c1_i32_193, %c8_i32_191 : i32
    %421 = arith.remsi %418, %420 : i32
    %c0_i32_194 = arith.constant 0 : i32
    %422 = arith.cmpi ne, %421, %c0_i32_194 : i32
    %c0_i32_195 = arith.constant 0 : i32
    %423 = arith.cmpi slt, %421, %c0_i32_195 : i32
    %c0_i32_196 = arith.constant 0 : i32
    %424 = arith.cmpi slt, %420, %c0_i32_196 : i32
    %425 = arith.xori %423, %424 : i1
    %426 = arith.andi %425, %422 : i1
    %427 = arith.addi %421, %420 : i32
    %428 = arith.select %426, %427, %421 : i32
    %429 = arith.sitofp %428 : i32 to f32
    %430 = arith.index_cast %417 : i32 to index
    %c0_197 = arith.constant 0 : index
    %431 = vector.load %arg2[%430, %c0_197] : memref<16x32xf32, #tpu.memory_space<vmem>>, vector<1x32xf32>
    %432 = arith.index_cast %417 : i32 to index
    %c0_198 = arith.constant 0 : index
    %433 = vector.load %arg3[%432, %c0_198] : memref<16x32xf32, #tpu.memory_space<vmem>>, vector<1x32xf32>
    %434 = vector.broadcast %429 : f32 to vector<1x32xf32>
    %435 = arith.mulf %434, %431 : vector<1x32xf32>
    %436 = arith.addf %435, %433 : vector<1x32xf32>
    %c4_199 = arith.constant 4 : index
    %c64_200 = arith.constant 64 : index
    %437 = vector.load %arg4[%c4_199, %c64_200] : memref<8x128xf32, #tpu.memory_space<vmem>>, vector<1x32xf32>
    tpu.vector_store %arg4[%c4_199, %c64_200], %436 {strides = array<i32>} : memref<8x128xf32, #tpu.memory_space<vmem>>, vector<1x32xf32>,
    %c19_i32 = arith.constant 19 : i32
    %438 = arith.addi %0, %c19_i32 : i32
    %439 = arith.index_cast %438 : i32 to index
    %440 = memref.load %arg1[%439] : memref<32xi32, #tpu.memory_space<smem>>
    %c19_i32_201 = arith.constant 19 : i32
    %441 = arith.addi %0, %c19_i32_201 : i32
    %c8_i32_202 = arith.constant 8 : i32
    %c0_i32_203 = arith.constant 0 : i32
    %442 = arith.cmpi eq, %c8_i32_202, %c0_i32_203 : i32
    %c1_i32_204 = arith.constant 1 : i32
    %443 = arith.select %442, %c1_i32_204, %c8_i32_202 : i32
    %444 = arith.remsi %441, %443 : i32
    %c0_i32_205 = arith.constant 0 : i32
    %445 = arith.cmpi ne, %444, %c0_i32_205 : i32
    %c0_i32_206 = arith.constant 0 : i32
    %446 = arith.cmpi slt, %444, %c0_i32_206 : i32
    %c0_i32_207 = arith.constant 0 : i32
    %447 = arith.cmpi slt, %443, %c0_i32_207 : i32
    %448 = arith.xori %446, %447 : i1
    %449 = arith.andi %448, %445 : i1
    %450 = arith.addi %444, %443 : i32
    %451 = arith.select %449, %450, %444 : i32
    %452 = arith.sitofp %451 : i32 to f32
    %453 = arith.index_cast %440 : i32 to index
    %c0_208 = arith.constant 0 : index
    %454 = vector.load %arg2[%453, %c0_208] : memref<16x32xf32, #tpu.memory_space<vmem>>, vector<1x32xf32>
    %455 = arith.index_cast %440 : i32 to index
    %c0_209 = arith.constant 0 : index
    %456 = vector.load %arg3[%455, %c0_209] : memref<16x32xf32, #tpu.memory_space<vmem>>, vector<1x32xf32>
    %457 = vector.broadcast %452 : f32 to vector<1x32xf32>
    %458 = arith.mulf %457, %454 : vector<1x32xf32>
    %459 = arith.addf %458, %456 : vector<1x32xf32>
    %c4_210 = arith.constant 4 : index
    %c96_211 = arith.constant 96 : index
    %460 = vector.load %arg4[%c4_210, %c96_211] : memref<8x128xf32, #tpu.memory_space<vmem>>, vector<1x32xf32>
    tpu.vector_store %arg4[%c4_210, %c96_211], %459 {strides = array<i32>} : memref<8x128xf32, #tpu.memory_space<vmem>>, vector<1x32xf32>,
    %c20_i32 = arith.constant 20 : i32
    %461 = arith.addi %0, %c20_i32 : i32
    %462 = arith.index_cast %461 : i32 to index
    %463 = memref.load %arg1[%462] : memref<32xi32, #tpu.memory_space<smem>>
    %c20_i32_212 = arith.constant 20 : i32
    %464 = arith.addi %0, %c20_i32_212 : i32
    %c8_i32_213 = arith.constant 8 : i32
    %c0_i32_214 = arith.constant 0 : i32
    %465 = arith.cmpi eq, %c8_i32_213, %c0_i32_214 : i32
    %c1_i32_215 = arith.constant 1 : i32
    %466 = arith.select %465, %c1_i32_215, %c8_i32_213 : i32
    %467 = arith.remsi %464, %466 : i32
    %c0_i32_216 = arith.constant 0 : i32
    %468 = arith.cmpi ne, %467, %c0_i32_216 : i32
    %c0_i32_217 = arith.constant 0 : i32
    %469 = arith.cmpi slt, %467, %c0_i32_217 : i32
    %c0_i32_218 = arith.constant 0 : i32
    %470 = arith.cmpi slt, %466, %c0_i32_218 : i32
    %471 = arith.xori %469, %470 : i1
    %472 = arith.andi %471, %468 : i1
    %473 = arith.addi %467, %466 : i32
    %474 = arith.select %472, %473, %467 : i32
    %475 = arith.sitofp %474 : i32 to f32
    %476 = arith.index_cast %463 : i32 to index
    %c0_219 = arith.constant 0 : index
    %477 = vector.load %arg2[%476, %c0_219] : memref<16x32xf32, #tpu.memory_space<vmem>>, vector<1x32xf32>
    %478 = arith.index_cast %463 : i32 to index
    %c0_220 = arith.constant 0 : index
    %479 = vector.load %arg3[%478, %c0_220] : memref<16x32xf32, #tpu.memory_space<vmem>>, vector<1x32xf32>
    %480 = vector.broadcast %475 : f32 to vector<1x32xf32>
    %481 = arith.mulf %480, %477 : vector<1x32xf32>
    %482 = arith.addf %481, %479 : vector<1x32xf32>
    %c5 = arith.constant 5 : index
    %c0_221 = arith.constant 0 : index
    %483 = vector.load %arg4[%c5, %c0_221] : memref<8x128xf32, #tpu.memory_space<vmem>>, vector<1x32xf32>
    tpu.vector_store %arg4[%c5, %c0_221], %482 {strides = array<i32>} : memref<8x128xf32, #tpu.memory_space<vmem>>, vector<1x32xf32>,
    %c21_i32 = arith.constant 21 : i32
    %484 = arith.addi %0, %c21_i32 : i32
    %485 = arith.index_cast %484 : i32 to index
    %486 = memref.load %arg1[%485] : memref<32xi32, #tpu.memory_space<smem>>
    %c21_i32_222 = arith.constant 21 : i32
    %487 = arith.addi %0, %c21_i32_222 : i32
    %c8_i32_223 = arith.constant 8 : i32
    %c0_i32_224 = arith.constant 0 : i32
    %488 = arith.cmpi eq, %c8_i32_223, %c0_i32_224 : i32
    %c1_i32_225 = arith.constant 1 : i32
    %489 = arith.select %488, %c1_i32_225, %c8_i32_223 : i32
    %490 = arith.remsi %487, %489 : i32
    %c0_i32_226 = arith.constant 0 : i32
    %491 = arith.cmpi ne, %490, %c0_i32_226 : i32
    %c0_i32_227 = arith.constant 0 : i32
    %492 = arith.cmpi slt, %490, %c0_i32_227 : i32
    %c0_i32_228 = arith.constant 0 : i32
    %493 = arith.cmpi slt, %489, %c0_i32_228 : i32
    %494 = arith.xori %492, %493 : i1
    %495 = arith.andi %494, %491 : i1
    %496 = arith.addi %490, %489 : i32
    %497 = arith.select %495, %496, %490 : i32
    %498 = arith.sitofp %497 : i32 to f32
    %499 = arith.index_cast %486 : i32 to index
    %c0_229 = arith.constant 0 : index
    %500 = vector.load %arg2[%499, %c0_229] : memref<16x32xf32, #tpu.memory_space<vmem>>, vector<1x32xf32>
    %501 = arith.index_cast %486 : i32 to index
    %c0_230 = arith.constant 0 : index
    %502 = vector.load %arg3[%501, %c0_230] : memref<16x32xf32, #tpu.memory_space<vmem>>, vector<1x32xf32>
    %503 = vector.broadcast %498 : f32 to vector<1x32xf32>
    %504 = arith.mulf %503, %500 : vector<1x32xf32>
    %505 = arith.addf %504, %502 : vector<1x32xf32>
    %c5_231 = arith.constant 5 : index
    %c32_232 = arith.constant 32 : index
    %506 = vector.load %arg4[%c5_231, %c32_232] : memref<8x128xf32, #tpu.memory_space<vmem>>, vector<1x32xf32>
    tpu.vector_store %arg4[%c5_231, %c32_232], %505 {strides = array<i32>} : memref<8x128xf32, #tpu.memory_space<vmem>>, vector<1x32xf32>,
    %c22_i32 = arith.constant 22 : i32
    %507 = arith.addi %0, %c22_i32 : i32
    %508 = arith.index_cast %507 : i32 to index
    %509 = memref.load %arg1[%508] : memref<32xi32, #tpu.memory_space<smem>>
    %c22_i32_233 = arith.constant 22 : i32
    %510 = arith.addi %0, %c22_i32_233 : i32
    %c8_i32_234 = arith.constant 8 : i32
    %c0_i32_235 = arith.constant 0 : i32
    %511 = arith.cmpi eq, %c8_i32_234, %c0_i32_235 : i32
    %c1_i32_236 = arith.constant 1 : i32
    %512 = arith.select %511, %c1_i32_236, %c8_i32_234 : i32
    %513 = arith.remsi %510, %512 : i32
    %c0_i32_237 = arith.constant 0 : i32
    %514 = arith.cmpi ne, %513, %c0_i32_237 : i32
    %c0_i32_238 = arith.constant 0 : i32
    %515 = arith.cmpi slt, %513, %c0_i32_238 : i32
    %c0_i32_239 = arith.constant 0 : i32
    %516 = arith.cmpi slt, %512, %c0_i32_239 : i32
    %517 = arith.xori %515, %516 : i1
    %518 = arith.andi %517, %514 : i1
    %519 = arith.addi %513, %512 : i32
    %520 = arith.select %518, %519, %513 : i32
    %521 = arith.sitofp %520 : i32 to f32
    %522 = arith.index_cast %509 : i32 to index
    %c0_240 = arith.constant 0 : index
    %523 = vector.load %arg2[%522, %c0_240] : memref<16x32xf32, #tpu.memory_space<vmem>>, vector<1x32xf32>
    %524 = arith.index_cast %509 : i32 to index
    %c0_241 = arith.constant 0 : index
    %525 = vector.load %arg3[%524, %c0_241] : memref<16x32xf32, #tpu.memory_space<vmem>>, vector<1x32xf32>
    %526 = vector.broadcast %521 : f32 to vector<1x32xf32>
    %527 = arith.mulf %526, %523 : vector<1x32xf32>
    %528 = arith.addf %527, %525 : vector<1x32xf32>
    %c5_242 = arith.constant 5 : index
    %c64_243 = arith.constant 64 : index
    %529 = vector.load %arg4[%c5_242, %c64_243] : memref<8x128xf32, #tpu.memory_space<vmem>>, vector<1x32xf32>
    tpu.vector_store %arg4[%c5_242, %c64_243], %528 {strides = array<i32>} : memref<8x128xf32, #tpu.memory_space<vmem>>, vector<1x32xf32>,
    %c23_i32 = arith.constant 23 : i32
    %530 = arith.addi %0, %c23_i32 : i32
    %531 = arith.index_cast %530 : i32 to index
    %532 = memref.load %arg1[%531] : memref<32xi32, #tpu.memory_space<smem>>
    %c23_i32_244 = arith.constant 23 : i32
    %533 = arith.addi %0, %c23_i32_244 : i32
    %c8_i32_245 = arith.constant 8 : i32
    %c0_i32_246 = arith.constant 0 : i32
    %534 = arith.cmpi eq, %c8_i32_245, %c0_i32_246 : i32
    %c1_i32_247 = arith.constant 1 : i32
    %535 = arith.select %534, %c1_i32_247, %c8_i32_245 : i32
    %536 = arith.remsi %533, %535 : i32
    %c0_i32_248 = arith.constant 0 : i32
    %537 = arith.cmpi ne, %536, %c0_i32_248 : i32
    %c0_i32_249 = arith.constant 0 : i32
    %538 = arith.cmpi slt, %536, %c0_i32_249 : i32
    %c0_i32_250 = arith.constant 0 : i32
    %539 = arith.cmpi slt, %535, %c0_i32_250 : i32
    %540 = arith.xori %538, %539 : i1
    %541 = arith.andi %540, %537 : i1
    %542 = arith.addi %536, %535 : i32
    %543 = arith.select %541, %542, %536 : i32
    %544 = arith.sitofp %543 : i32 to f32
    %545 = arith.index_cast %532 : i32 to index
    %c0_251 = arith.constant 0 : index
    %546 = vector.load %arg2[%545, %c0_251] : memref<16x32xf32, #tpu.memory_space<vmem>>, vector<1x32xf32>
    %547 = arith.index_cast %532 : i32 to index
    %c0_252 = arith.constant 0 : index
    %548 = vector.load %arg3[%547, %c0_252] : memref<16x32xf32, #tpu.memory_space<vmem>>, vector<1x32xf32>
    %549 = vector.broadcast %544 : f32 to vector<1x32xf32>
    %550 = arith.mulf %549, %546 : vector<1x32xf32>
    %551 = arith.addf %550, %548 : vector<1x32xf32>
    %c5_253 = arith.constant 5 : index
    %c96_254 = arith.constant 96 : index
    %552 = vector.load %arg4[%c5_253, %c96_254] : memref<8x128xf32, #tpu.memory_space<vmem>>, vector<1x32xf32>
    tpu.vector_store %arg4[%c5_253, %c96_254], %551 {strides = array<i32>} : memref<8x128xf32, #tpu.memory_space<vmem>>, vector<1x32xf32>,
    %c24_i32 = arith.constant 24 : i32
    %553 = arith.addi %0, %c24_i32 : i32
    %554 = arith.index_cast %553 : i32 to index
    %555 = memref.load %arg1[%554] : memref<32xi32, #tpu.memory_space<smem>>
    %c24_i32_255 = arith.constant 24 : i32
    %556 = arith.addi %0, %c24_i32_255 : i32
    %c8_i32_256 = arith.constant 8 : i32
    %c0_i32_257 = arith.constant 0 : i32
    %557 = arith.cmpi eq, %c8_i32_256, %c0_i32_257 : i32
    %c1_i32_258 = arith.constant 1 : i32
    %558 = arith.select %557, %c1_i32_258, %c8_i32_256 : i32
    %559 = arith.remsi %556, %558 : i32
    %c0_i32_259 = arith.constant 0 : i32
    %560 = arith.cmpi ne, %559, %c0_i32_259 : i32
    %c0_i32_260 = arith.constant 0 : i32
    %561 = arith.cmpi slt, %559, %c0_i32_260 : i32
    %c0_i32_261 = arith.constant 0 : i32
    %562 = arith.cmpi slt, %558, %c0_i32_261 : i32
    %563 = arith.xori %561, %562 : i1
    %564 = arith.andi %563, %560 : i1
    %565 = arith.addi %559, %558 : i32
    %566 = arith.select %564, %565, %559 : i32
    %567 = arith.sitofp %566 : i32 to f32
    %568 = arith.index_cast %555 : i32 to index
    %c0_262 = arith.constant 0 : index
    %569 = vector.load %arg2[%568, %c0_262] : memref<16x32xf32, #tpu.memory_space<vmem>>, vector<1x32xf32>
    %570 = arith.index_cast %555 : i32 to index
    %c0_263 = arith.constant 0 : index
    %571 = vector.load %arg3[%570, %c0_263] : memref<16x32xf32, #tpu.memory_space<vmem>>, vector<1x32xf32>
    %572 = vector.broadcast %567 : f32 to vector<1x32xf32>
    %573 = arith.mulf %572, %569 : vector<1x32xf32>
    %574 = arith.addf %573, %571 : vector<1x32xf32>
    %c6 = arith.constant 6 : index
    %c0_264 = arith.constant 0 : index
    %575 = vector.load %arg4[%c6, %c0_264] : memref<8x128xf32, #tpu.memory_space<vmem>>, vector<1x32xf32>
    tpu.vector_store %arg4[%c6, %c0_264], %574 {strides = array<i32>} : memref<8x128xf32, #tpu.memory_space<vmem>>, vector<1x32xf32>,
    %c25_i32 = arith.constant 25 : i32
    %576 = arith.addi %0, %c25_i32 : i32
    %577 = arith.index_cast %576 : i32 to index
    %578 = memref.load %arg1[%577] : memref<32xi32, #tpu.memory_space<smem>>
    %c25_i32_265 = arith.constant 25 : i32
    %579 = arith.addi %0, %c25_i32_265 : i32
    %c8_i32_266 = arith.constant 8 : i32
    %c0_i32_267 = arith.constant 0 : i32
    %580 = arith.cmpi eq, %c8_i32_266, %c0_i32_267 : i32
    %c1_i32_268 = arith.constant 1 : i32
    %581 = arith.select %580, %c1_i32_268, %c8_i32_266 : i32
    %582 = arith.remsi %579, %581 : i32
    %c0_i32_269 = arith.constant 0 : i32
    %583 = arith.cmpi ne, %582, %c0_i32_269 : i32
    %c0_i32_270 = arith.constant 0 : i32
    %584 = arith.cmpi slt, %582, %c0_i32_270 : i32
    %c0_i32_271 = arith.constant 0 : i32
    %585 = arith.cmpi slt, %581, %c0_i32_271 : i32
    %586 = arith.xori %584, %585 : i1
    %587 = arith.andi %586, %583 : i1
    %588 = arith.addi %582, %581 : i32
    %589 = arith.select %587, %588, %582 : i32
    %590 = arith.sitofp %589 : i32 to f32
    %591 = arith.index_cast %578 : i32 to index
    %c0_272 = arith.constant 0 : index
    %592 = vector.load %arg2[%591, %c0_272] : memref<16x32xf32, #tpu.memory_space<vmem>>, vector<1x32xf32>
    %593 = arith.index_cast %578 : i32 to index
    %c0_273 = arith.constant 0 : index
    %594 = vector.load %arg3[%593, %c0_273] : memref<16x32xf32, #tpu.memory_space<vmem>>, vector<1x32xf32>
    %595 = vector.broadcast %590 : f32 to vector<1x32xf32>
    %596 = arith.mulf %595, %592 : vector<1x32xf32>
    %597 = arith.addf %596, %594 : vector<1x32xf32>
    %c6_274 = arith.constant 6 : index
    %c32_275 = arith.constant 32 : index
    %598 = vector.load %arg4[%c6_274, %c32_275] : memref<8x128xf32, #tpu.memory_space<vmem>>, vector<1x32xf32>
    tpu.vector_store %arg4[%c6_274, %c32_275], %597 {strides = array<i32>} : memref<8x128xf32, #tpu.memory_space<vmem>>, vector<1x32xf32>,
    %c26_i32 = arith.constant 26 : i32
    %599 = arith.addi %0, %c26_i32 : i32
    %600 = arith.index_cast %599 : i32 to index
    %601 = memref.load %arg1[%600] : memref<32xi32, #tpu.memory_space<smem>>
    %c26_i32_276 = arith.constant 26 : i32
    %602 = arith.addi %0, %c26_i32_276 : i32
    %c8_i32_277 = arith.constant 8 : i32
    %c0_i32_278 = arith.constant 0 : i32
    %603 = arith.cmpi eq, %c8_i32_277, %c0_i32_278 : i32
    %c1_i32_279 = arith.constant 1 : i32
    %604 = arith.select %603, %c1_i32_279, %c8_i32_277 : i32
    %605 = arith.remsi %602, %604 : i32
    %c0_i32_280 = arith.constant 0 : i32
    %606 = arith.cmpi ne, %605, %c0_i32_280 : i32
    %c0_i32_281 = arith.constant 0 : i32
    %607 = arith.cmpi slt, %605, %c0_i32_281 : i32
    %c0_i32_282 = arith.constant 0 : i32
    %608 = arith.cmpi slt, %604, %c0_i32_282 : i32
    %609 = arith.xori %607, %608 : i1
    %610 = arith.andi %609, %606 : i1
    %611 = arith.addi %605, %604 : i32
    %612 = arith.select %610, %611, %605 : i32
    %613 = arith.sitofp %612 : i32 to f32
    %614 = arith.index_cast %601 : i32 to index
    %c0_283 = arith.constant 0 : index
    %615 = vector.load %arg2[%614, %c0_283] : memref<16x32xf32, #tpu.memory_space<vmem>>, vector<1x32xf32>
    %616 = arith.index_cast %601 : i32 to index
    %c0_284 = arith.constant 0 : index
    %617 = vector.load %arg3[%616, %c0_284] : memref<16x32xf32, #tpu.memory_space<vmem>>, vector<1x32xf32>
    %618 = vector.broadcast %613 : f32 to vector<1x32xf32>
    %619 = arith.mulf %618, %615 : vector<1x32xf32>
    %620 = arith.addf %619, %617 : vector<1x32xf32>
    %c6_285 = arith.constant 6 : index
    %c64_286 = arith.constant 64 : index
    %621 = vector.load %arg4[%c6_285, %c64_286] : memref<8x128xf32, #tpu.memory_space<vmem>>, vector<1x32xf32>
    tpu.vector_store %arg4[%c6_285, %c64_286], %620 {strides = array<i32>} : memref<8x128xf32, #tpu.memory_space<vmem>>, vector<1x32xf32>,
    %c27_i32 = arith.constant 27 : i32
    %622 = arith.addi %0, %c27_i32 : i32
    %623 = arith.index_cast %622 : i32 to index
    %624 = memref.load %arg1[%623] : memref<32xi32, #tpu.memory_space<smem>>
    %c27_i32_287 = arith.constant 27 : i32
    %625 = arith.addi %0, %c27_i32_287 : i32
    %c8_i32_288 = arith.constant 8 : i32
    %c0_i32_289 = arith.constant 0 : i32
    %626 = arith.cmpi eq, %c8_i32_288, %c0_i32_289 : i32
    %c1_i32_290 = arith.constant 1 : i32
    %627 = arith.select %626, %c1_i32_290, %c8_i32_288 : i32
    %628 = arith.remsi %625, %627 : i32
    %c0_i32_291 = arith.constant 0 : i32
    %629 = arith.cmpi ne, %628, %c0_i32_291 : i32
    %c0_i32_292 = arith.constant 0 : i32
    %630 = arith.cmpi slt, %628, %c0_i32_292 : i32
    %c0_i32_293 = arith.constant 0 : i32
    %631 = arith.cmpi slt, %627, %c0_i32_293 : i32
    %632 = arith.xori %630, %631 : i1
    %633 = arith.andi %632, %629 : i1
    %634 = arith.addi %628, %627 : i32
    %635 = arith.select %633, %634, %628 : i32
    %636 = arith.sitofp %635 : i32 to f32
    %637 = arith.index_cast %624 : i32 to index
    %c0_294 = arith.constant 0 : index
    %638 = vector.load %arg2[%637, %c0_294] : memref<16x32xf32, #tpu.memory_space<vmem>>, vector<1x32xf32>
    %639 = arith.index_cast %624 : i32 to index
    %c0_295 = arith.constant 0 : index
    %640 = vector.load %arg3[%639, %c0_295] : memref<16x32xf32, #tpu.memory_space<vmem>>, vector<1x32xf32>
    %641 = vector.broadcast %636 : f32 to vector<1x32xf32>
    %642 = arith.mulf %641, %638 : vector<1x32xf32>
    %643 = arith.addf %642, %640 : vector<1x32xf32>
    %c6_296 = arith.constant 6 : index
    %c96_297 = arith.constant 96 : index
    %644 = vector.load %arg4[%c6_296, %c96_297] : memref<8x128xf32, #tpu.memory_space<vmem>>, vector<1x32xf32>
    tpu.vector_store %arg4[%c6_296, %c96_297], %643 {strides = array<i32>} : memref<8x128xf32, #tpu.memory_space<vmem>>, vector<1x32xf32>,
    %c28_i32 = arith.constant 28 : i32
    %645 = arith.addi %0, %c28_i32 : i32
    %646 = arith.index_cast %645 : i32 to index
    %647 = memref.load %arg1[%646] : memref<32xi32, #tpu.memory_space<smem>>
    %c28_i32_298 = arith.constant 28 : i32
    %648 = arith.addi %0, %c28_i32_298 : i32
    %c8_i32_299 = arith.constant 8 : i32
    %c0_i32_300 = arith.constant 0 : i32
    %649 = arith.cmpi eq, %c8_i32_299, %c0_i32_300 : i32
    %c1_i32_301 = arith.constant 1 : i32
    %650 = arith.select %649, %c1_i32_301, %c8_i32_299 : i32
    %651 = arith.remsi %648, %650 : i32
    %c0_i32_302 = arith.constant 0 : i32
    %652 = arith.cmpi ne, %651, %c0_i32_302 : i32
    %c0_i32_303 = arith.constant 0 : i32
    %653 = arith.cmpi slt, %651, %c0_i32_303 : i32
    %c0_i32_304 = arith.constant 0 : i32
    %654 = arith.cmpi slt, %650, %c0_i32_304 : i32
    %655 = arith.xori %653, %654 : i1
    %656 = arith.andi %655, %652 : i1
    %657 = arith.addi %651, %650 : i32
    %658 = arith.select %656, %657, %651 : i32
    %659 = arith.sitofp %658 : i32 to f32
    %660 = arith.index_cast %647 : i32 to index
    %c0_305 = arith.constant 0 : index
    %661 = vector.load %arg2[%660, %c0_305] : memref<16x32xf32, #tpu.memory_space<vmem>>, vector<1x32xf32>
    %662 = arith.index_cast %647 : i32 to index
    %c0_306 = arith.constant 0 : index
    %663 = vector.load %arg3[%662, %c0_306] : memref<16x32xf32, #tpu.memory_space<vmem>>, vector<1x32xf32>
    %664 = vector.broadcast %659 : f32 to vector<1x32xf32>
    %665 = arith.mulf %664, %661 : vector<1x32xf32>
    %666 = arith.addf %665, %663 : vector<1x32xf32>
    %c7 = arith.constant 7 : index
    %c0_307 = arith.constant 0 : index
    %667 = vector.load %arg4[%c7, %c0_307] : memref<8x128xf32, #tpu.memory_space<vmem>>, vector<1x32xf32>
    tpu.vector_store %arg4[%c7, %c0_307], %666 {strides = array<i32>} : memref<8x128xf32, #tpu.memory_space<vmem>>, vector<1x32xf32>,
    %c29_i32 = arith.constant 29 : i32
    %668 = arith.addi %0, %c29_i32 : i32
    %669 = arith.index_cast %668 : i32 to index
    %670 = memref.load %arg1[%669] : memref<32xi32, #tpu.memory_space<smem>>
    %c29_i32_308 = arith.constant 29 : i32
    %671 = arith.addi %0, %c29_i32_308 : i32
    %c8_i32_309 = arith.constant 8 : i32
    %c0_i32_310 = arith.constant 0 : i32
    %672 = arith.cmpi eq, %c8_i32_309, %c0_i32_310 : i32
    %c1_i32_311 = arith.constant 1 : i32
    %673 = arith.select %672, %c1_i32_311, %c8_i32_309 : i32
    %674 = arith.remsi %671, %673 : i32
    %c0_i32_312 = arith.constant 0 : i32
    %675 = arith.cmpi ne, %674, %c0_i32_312 : i32
    %c0_i32_313 = arith.constant 0 : i32
    %676 = arith.cmpi slt, %674, %c0_i32_313 : i32
    %c0_i32_314 = arith.constant 0 : i32
    %677 = arith.cmpi slt, %673, %c0_i32_314 : i32
    %678 = arith.xori %676, %677 : i1
    %679 = arith.andi %678, %675 : i1
    %680 = arith.addi %674, %673 : i32
    %681 = arith.select %679, %680, %674 : i32
    %682 = arith.sitofp %681 : i32 to f32
    %683 = arith.index_cast %670 : i32 to index
    %c0_315 = arith.constant 0 : index
    %684 = vector.load %arg2[%683, %c0_315] : memref<16x32xf32, #tpu.memory_space<vmem>>, vector<1x32xf32>
    %685 = arith.index_cast %670 : i32 to index
    %c0_316 = arith.constant 0 : index
    %686 = vector.load %arg3[%685, %c0_316] : memref<16x32xf32, #tpu.memory_space<vmem>>, vector<1x32xf32>
    %687 = vector.broadcast %682 : f32 to vector<1x32xf32>
    %688 = arith.mulf %687, %684 : vector<1x32xf32>
    %689 = arith.addf %688, %686 : vector<1x32xf32>
    %c7_317 = arith.constant 7 : index
    %c32_318 = arith.constant 32 : index
    %690 = vector.load %arg4[%c7_317, %c32_318] : memref<8x128xf32, #tpu.memory_space<vmem>>, vector<1x32xf32>
    tpu.vector_store %arg4[%c7_317, %c32_318], %689 {strides = array<i32>} : memref<8x128xf32, #tpu.memory_space<vmem>>, vector<1x32xf32>,
    %c30_i32 = arith.constant 30 : i32
    %691 = arith.addi %0, %c30_i32 : i32
    %692 = arith.index_cast %691 : i32 to index
    %693 = memref.load %arg1[%692] : memref<32xi32, #tpu.memory_space<smem>>
    %c30_i32_319 = arith.constant 30 : i32
    %694 = arith.addi %0, %c30_i32_319 : i32
    %c8_i32_320 = arith.constant 8 : i32
    %c0_i32_321 = arith.constant 0 : i32
    %695 = arith.cmpi eq, %c8_i32_320, %c0_i32_321 : i32
    %c1_i32_322 = arith.constant 1 : i32
    %696 = arith.select %695, %c1_i32_322, %c8_i32_320 : i32
    %697 = arith.remsi %694, %696 : i32
    %c0_i32_323 = arith.constant 0 : i32
    %698 = arith.cmpi ne, %697, %c0_i32_323 : i32
    %c0_i32_324 = arith.constant 0 : i32
    %699 = arith.cmpi slt, %697, %c0_i32_324 : i32
    %c0_i32_325 = arith.constant 0 : i32
    %700 = arith.cmpi slt, %696, %c0_i32_325 : i32
    %701 = arith.xori %699, %700 : i1
    %702 = arith.andi %701, %698 : i1
    %703 = arith.addi %697, %696 : i32
    %704 = arith.select %702, %703, %697 : i32
    %705 = arith.sitofp %704 : i32 to f32
    %706 = arith.index_cast %693 : i32 to index
    %c0_326 = arith.constant 0 : index
    %707 = vector.load %arg2[%706, %c0_326] : memref<16x32xf32, #tpu.memory_space<vmem>>, vector<1x32xf32>
    %708 = arith.index_cast %693 : i32 to index
    %c0_327 = arith.constant 0 : index
    %709 = vector.load %arg3[%708, %c0_327] : memref<16x32xf32, #tpu.memory_space<vmem>>, vector<1x32xf32>
    %710 = vector.broadcast %705 : f32 to vector<1x32xf32>
    %711 = arith.mulf %710, %707 : vector<1x32xf32>
    %712 = arith.addf %711, %709 : vector<1x32xf32>
    %c7_328 = arith.constant 7 : index
    %c64_329 = arith.constant 64 : index
    %713 = vector.load %arg4[%c7_328, %c64_329] : memref<8x128xf32, #tpu.memory_space<vmem>>, vector<1x32xf32>
    tpu.vector_store %arg4[%c7_328, %c64_329], %712 {strides = array<i32>} : memref<8x128xf32, #tpu.memory_space<vmem>>, vector<1x32xf32>,
    %c31_i32 = arith.constant 31 : i32
    %714 = arith.addi %0, %c31_i32 : i32
    %715 = arith.index_cast %714 : i32 to index
    %716 = memref.load %arg1[%715] : memref<32xi32, #tpu.memory_space<smem>>
    %c31_i32_330 = arith.constant 31 : i32
    %717 = arith.addi %0, %c31_i32_330 : i32
    %c8_i32_331 = arith.constant 8 : i32
    %c0_i32_332 = arith.constant 0 : i32
    %718 = arith.cmpi eq, %c8_i32_331, %c0_i32_332 : i32
    %c1_i32_333 = arith.constant 1 : i32
    %719 = arith.select %718, %c1_i32_333, %c8_i32_331 : i32
    %720 = arith.remsi %717, %719 : i32
    %c0_i32_334 = arith.constant 0 : i32
    %721 = arith.cmpi ne, %720, %c0_i32_334 : i32
    %c0_i32_335 = arith.constant 0 : i32
    %722 = arith.cmpi slt, %720, %c0_i32_335 : i32
    %c0_i32_336 = arith.constant 0 : i32
    %723 = arith.cmpi slt, %719, %c0_i32_336 : i32
    %724 = arith.xori %722, %723 : i1
    %725 = arith.andi %724, %721 : i1
    %726 = arith.addi %720, %719 : i32
    %727 = arith.select %725, %726, %720 : i32
    %728 = arith.sitofp %727 : i32 to f32
    %729 = arith.index_cast %716 : i32 to index
    %c0_337 = arith.constant 0 : index
    %730 = vector.load %arg2[%729, %c0_337] : memref<16x32xf32, #tpu.memory_space<vmem>>, vector<1x32xf32>
    %731 = arith.index_cast %716 : i32 to index
    %c0_338 = arith.constant 0 : index
    %732 = vector.load %arg3[%731, %c0_338] : memref<16x32xf32, #tpu.memory_space<vmem>>, vector<1x32xf32>
    %733 = vector.broadcast %728 : f32 to vector<1x32xf32>
    %734 = arith.mulf %733, %730 : vector<1x32xf32>
    %735 = arith.addf %734, %732 : vector<1x32xf32>
    %c7_339 = arith.constant 7 : index
    %c96_340 = arith.constant 96 : index
    %736 = vector.load %arg4[%c7_339, %c96_340] : memref<8x128xf32, #tpu.memory_space<vmem>>, vector<1x32xf32>
    tpu.vector_store %arg4[%c7_339, %c96_340], %735 {strides = array<i32>} : memref<8x128xf32, #tpu.memory_space<vmem>>, vector<1x32xf32>,
    return
  }
  func.func @transform_0(%arg0: i32, %arg1: memref<32xi32, #tpu.memory_space<smem>>) -> (i32, i32) {
    %c0_i32 = arith.constant 0 : i32
    %c0_i32_0 = arith.constant 0 : i32
    %c0_i32_1 = arith.constant 0 : i32
    return %c0_i32, %c0_i32_0 : i32, i32
  }
  func.func @transform_1(%arg0: i32, %arg1: memref<32xi32, #tpu.memory_space<smem>>) -> (i32, i32) {
    %c0_i32 = arith.constant 0 : i32
    %c0_i32_0 = arith.constant 0 : i32
    %c0_i32_1 = arith.constant 0 : i32
    return %c0_i32, %c0_i32_0 : i32, i32
  }
  func.func @transform_2(%arg0: i32, %arg1: memref<32xi32, #tpu.memory_space<smem>>) -> (i32, i32) {
    %c0_i32 = arith.constant 0 : i32
    %c0_i32_0 = arith.constant 0 : i32
    return %arg0, %c0_i32 : i32, i32
  }
}

</mosaic_0001>

<bundles_post_ra>
// kernel: tpu_custom_call.1
= control target key start
LH: loop header
LB: loop body
LE: loop exit
PB: predicated region body
PF: predicated region fallthrough
CT: control target
= control target key end

     0   :  { %s1103_s15 = smov [#allocation3]   ;;  %s1280_s0 = inlined_call_operand.hbm [shape: s32[32], index: 0, kind: input, shape index: {}]   ;;  %s1281_s1 = inlined_call_operand.hbm [shape: f32[16,32], index: 1, kind: input, shape index: {}]   ;;  %s1282_s2 = inlined_call_operand.hbm [shape: f32[16,32], index: 2, kind: input, shape index: {}]   ;;  %s1283_s3 = inlined_call_operand.hbm [shape: f32[8,128], index: 3, kind: output, shape index: {}]  }
   0x1   :  { %s9_s14 = sshll.u32 %s1280_s0, 4  ;;  %s10_s14 = int_to_ptr.hbm [resolvable:$true] %s9_s14 }
   0x2   :  { %12 = dma.hbm_to_smem %s10_s14, 16, %s1103_s15, [#allocation2] }
   0x3   :  { %1095 = dma.done.wait [#allocation2], 16 }
   0x4   :  { %1096 = vsyncadd [#allocation2], 4294967280 }
   0x5   :  { %15 = sfence }
   0x6   :  { %16 = vsyncpa [#allocation5], 0 }
   0x7   :  { %17 = vsyncpa [#allocation8], 0 }
   0x8   :  { %18 = vsyncpa [#allocation6], 0  ;;  %s23_s18 = sshll.u32 %s1281_s1, 4  ;;  %s1104_s19 = smov [#allocation4]   ;;  %s24_s18 = int_to_ptr.hbm [resolvable:$true] %s23_s18 }
   0x9   :  { %s25_s20 = sshll.u32 %s1104_s19, 4  ;;  %s36_s0 = sshll.u32 %s1282_s2, 4  ;;  %s26_s20 = int_to_ptr.vmem [resolvable:$true] %s25_s20  ;;  %s37_s0 = int_to_ptr.hbm [resolvable:$true] %s36_s0 }
   0xa   :  { %s1105_s23 = smov 128   ;;  %s1106_s24 = smov 8  }
   0xb   :  { %31 = dma.hbm_to_vmem [thread:$0]  %s24_s18, 256, %s26_s20, [#allocation5], %s1105_s23, %s1105_s23, %s1106_s24  }
   0xc   :  { %s1107_s25 = smov [#allocation7]  }
   0xd   :  { %s38_s26 = sshll.u32 %s1107_s25, 4  ;;  %s39_s26 = int_to_ptr.vmem [resolvable:$true] %s38_s26 }
   0xe   :  { %44 = dma.hbm_to_vmem [thread:$0]  %s37_s0, 256, %s39_s26, [#allocation8], %s1105_s23, %s1105_s23, %s1106_s24  }
   0xf   :  { %1097 = dma.done.wait [#allocation5], 256  }
  0x10   :  { %1098 = vsyncadd [#allocation5], 4294967040 }
  0x11   :  { %1099 = dma.done.wait [#allocation8], 256  }
  0x12   :  { %1100 = vsyncadd [#allocation8], 4294967040  ;;  %s971_s1 = sld [smem:[#allocation3 + $0x1]]  ;;  %s1108_s9 = smov 32   ;;  %vm75_vm0 = vcmask 253952   ;;  %vm103_vm1 = vcmask 516352  }
  0x13   :  { %s973_s27 = sld [smem:[#allocation3 + $0x3]]  ;;  %s1109_s12 = smov 96   ;;  %vm131_vm2 = vcmask 778752   ;;  %vm159_vm3 = vcmask 1041152  }
  0x14   :  { %s972_s28 = sld [smem:[#allocation3 + $0x2]]  ;;  %s1110_s17 = smov 64  }
  0x15   :  { %s1141_s29 = sld [smem:[#allocation3 + $0x5]] }
  0x16   :  { %s1143_s30 = sld [smem:[#allocation3 + $0x9]] }
  0x17   :  { %s1145_s2 = sld [smem:[#allocation3 + $0xa]] }
  0x18   :  { %s92_s4 = scalar_lea.vmem [#allocation4], %s971_s1  ;;  %s94_s5 = scalar_lea.vmem [#allocation7], %s971_s1 }
  0x19   :  { %v93_v0 = vld [vmem:[%s92_s4] sm:$0x1]  ;;  %s148_s6 = scalar_lea.vmem [#allocation4], %s973_s27  ;;  %s150_s7 = scalar_lea.vmem [#allocation7], %s973_s27 }
  0x1a   :  { %v95_v1 = vld [vmem:[%s94_s5] sm:$0x1]  ;;  %s120_s8 = scalar_lea.vmem [#allocation4], %s972_s28  ;;  %s122_s11 = scalar_lea.vmem [#allocation7], %s972_s28 }
  0x1b   :  { %v98_v2 = vadd.f32 %v95_v1, %v93_v0  ;;  %v149_v3 = vld [vmem:[%s148_s6] sm:$0x1]  ;;  %s199_s10 = scalar_lea.vmem [#allocation4], %s1141_s29  ;;  %s976_s13 = sld [smem:[#allocation3 + $0x6]] }
  0x1c   :  { %v151_v4 = vld [vmem:[%s150_s7] sm:$0x1]  ;;  %v153_v5 = vmul.f32 3.0, %v149_v3  ;;  %s201_s14 = scalar_lea.vmem [#allocation7], %s1141_s29  ;;  %s1151_s15 = sld [smem:[#allocation3 + $0xd]] }
  0x1d   :  { %v121_v6 = vld [vmem:[%s120_s8] sm:$0x1]  ;;  %100 = vrot.lane.b32.xlu0 %v98_v2, %s1108_s9  ;;  %s1153_s16 = sld [smem:[#allocation3 + $0x7]]  ;;  %s330_s18 = scalar_lea.vmem [#allocation4], %s1145_s2 }
  0x1e   :  { %v125_v7 = vmul.f32 2.0, %v121_v6  ;;  %v200_v8 = vld [vmem:[%s199_s10] sm:$0x1]  ;;  %v154_v9 = vadd.f32 %v153_v5, %v151_v4  ;;  %s1157_s19 = sld [smem:[#allocation3 + $0x11]]  ;;  %s303_s20 = scalar_lea.vmem [#allocation4], %s1143_s30 }
  0x1f   :  { %v123_v10 = vld [vmem:[%s122_s11] sm:$0x1]  ;;  %v204_v11 = vmul.f32 5.0, %v200_v8  ;;  %s305_s21 = scalar_lea.vmem [#allocation7], %s1143_s30  ;;  %s1162_s23 = sld [smem:[#allocation3 + $0x1d]] }
  0x20   :  { %156 = vrot.lane.b32.xlu1 %v154_v9, %s1109_s12  ;;  %v126_v12 = vadd.f32 %v125_v7, %v123_v10  ;;  %v202_v13 = vld [vmem:[%s201_s14] sm:$0x1]  ;;  %s332_s24 = scalar_lea.vmem [#allocation7], %s1145_s2  ;;  %s1165_s25 = sld [smem:[#allocation3 + $0x19]] }
  0x21   :  { %v205_v14 = vadd.f32 %v204_v11, %v202_v13  ;;  %v331_v15 = vld [vmem:[%s330_s18] sm:$0x1]  ;;  %s226_s22 = scalar_lea.vmem [#allocation4], %s976_s13  ;;  %s228_s0 = scalar_lea.vmem [#allocation7], %s976_s13 }
  0x22   :  { %v304_v16 = vld [vmem:[%s303_s20] sm:$0x1]  ;;  %v335_v20 = vmul.f32 2.0, %v331_v15  ;;  %s407_s26 = scalar_lea.vmem [#allocation4], %s1151_s15  ;;  %s409_s28 = scalar_lea.vmem [#allocation7], %s1151_s15 }
  0x23   :  { %v306_v17 = vld [vmem:[%s305_s21] sm:$0x1]  ;;  %s253_s1 = scalar_lea.vmem [#allocation4], %s1153_s16  ;;  %s255_s27 = scalar_lea.vmem [#allocation7], %s1153_s16 }
  0x24   :  { %v227_v18 = vld [vmem:[%s226_s22] sm:$0x1]  ;;  %v309_v22 = vadd.f32 %v306_v17, %v304_v16  ;;  %s981_s29 = sld [smem:[#allocation3 + $0xb]]  ;;  %s511_s30 = scalar_lea.vmem [#allocation4], %s1157_s19 }
  0x25   :  { %128 = vrot.lane.b32.xlu0 %v126_v12, %s1110_s17  ;;  %v229_v19 = vld [vmem:[%s228_s0] sm:$0x1]  ;;  %v231_v21 = vmul.f32 6.0, %v227_v18  ;;  %s1175_s2 = sld [smem:[#allocation3 + $0x12]]  ;;  %s513_s4 = scalar_lea.vmem [#allocation7], %s1157_s19 }
  0x26   :  { %v333_v23 = vld [vmem:[%s332_s24] sm:$0x1]  ;;  %s1178_s5 = sld [smem:[#allocation3 + $0x15]]  ;;  %s823_s7 = scalar_lea.vmem [#allocation4], %s1162_s23 }
  0x27   :  { %v232_v24 = vadd.f32 %v231_v21, %v229_v19  ;;  %v408_v25 = vld [vmem:[%s407_s26] sm:$0x1]  ;;  %v336_v27 = vadd.f32 %v335_v20, %v333_v23  ;;  %s1180_s6 = sld [smem:[#allocation3 + $0x16]]  ;;  %s719_s8 = scalar_lea.vmem [#allocation4], %s1165_s25 }
  0x28   :  { %207 = vrot.lane.b32.xlu1 %v205_v14, %s1108_s9  ;;  %v254_v26 = vld [vmem:[%s253_s1] sm:$0x1]  ;;  %v412_v29 = vmul.f32 5.0, %v408_v25  ;;  %s721_s13 = scalar_lea.vmem [#allocation7], %s1165_s25  ;;  %s1187_s14 = sld [smem:[#allocation3 + $0x1e]] }
  0x29   :  { %234 = vrot.lane.b32.xlu2 %v232_v24, %s1110_s17  ;;  %v258_v28 = vmul.f32 7.0, %v254_v26  ;;  %v256_v30 = vld [vmem:[%s255_s27] sm:$0x1]  ;;  %s825_s15 = scalar_lea.vmem [#allocation7], %s1162_s23  ;;  %s1192_s18 = sld [smem:[#allocation3 + $0xf]] }
  0x2a   :  { %v410_v31 = vld [vmem:[%s409_s28] sm:$0x1]  ;;  %s357_s10 = scalar_lea.vmem [#allocation4], %s981_s29  ;;  %s359_s11 = scalar_lea.vmem [#allocation7], %s981_s29 }
  0x2b   :  { %v512_v32 = vld [vmem:[%s511_s30] sm:$0x1]  ;;  %v259_v33 = vadd.f32 %v258_v28, %v256_v30  ;;  %v413_v35 = vadd.f32 %v412_v29, %v410_v31  ;;  %s538_s19 = scalar_lea.vmem [#allocation4], %s1175_s2  ;;  %s1196_s20 = sld [smem:[#allocation3 + $0xe]] }
  0x2c   :  { %v514_v34 = vld [vmem:[%s513_s4] sm:$0x1]  ;;  %s615_s16 = scalar_lea.vmem [#allocation4], %s1178_s5  ;;  %s617_s22 = scalar_lea.vmem [#allocation7], %s1178_s5 }
  0x2d   :  { %311 = vrot.lane.b32.xlu0 %v309_v22, %s1108_s9  ;;  %v517_v36 = vadd.f32 %v514_v34, %v512_v32  ;;  %v824_v37 = vld [vmem:[%s823_s7] sm:$0x1]  ;;  %s642_s21 = scalar_lea.vmem [#allocation4], %s1180_s6  ;;  %s540_s0 = scalar_lea.vmem [#allocation7], %s1175_s2 }
  0x2e   :  { %v720_v38 = vld [vmem:[%s719_s8] sm:$0x1]  ;;  %v828_v43 = vmul.f32 5.0, %v824_v37  ;;  %s1202_s23 = sld [smem:[#allocation3 + $0x17]]  ;;  %s644_s25 = scalar_lea.vmem [#allocation7], %s1180_s6 }
  0x2f   :  { %v358_v39 = vld [vmem:[%s357_s10] sm:$0x1]  ;;  %s1204_s24 = sld [smem:[#allocation3 + $0x1a]]  ;;  %s850_s1 = scalar_lea.vmem [#allocation4], %s1187_s14 }
  0x30   :  { %338 = vrot.lane.b32.xlu1 %v336_v27, %s1110_s17  ;;  %v360_v40 = vld [vmem:[%s359_s11] sm:$0x1]  ;;  %v362_v42 = vmul.f32 3.0, %v358_v39  ;;  %s1208_s26 = sld [smem:[#allocation3 + $0x1b]]  ;;  %s461_s28 = scalar_lea.vmem [#allocation4], %s1192_s18 }
  0x31   :  { %261 = vrot.lane.b32.xlu2 %v259_v33, %s1109_s12  ;;  %v722_v41 = vld [vmem:[%s721_s13] sm:$0x1]  ;;  %s434_s27 = scalar_lea.vmem [#allocation4], %s1196_s20  ;;  %s436_s29 = scalar_lea.vmem [#allocation7], %s1196_s20 }
  0x32   :  { %v363_v44 = vadd.f32 %v362_v42, %v360_v40  ;;  %v826_v45 = vld [vmem:[%s825_s15] sm:$0x1]  ;;  %v725_v46 = vadd.f32 %v722_v41, %v720_v38  ;;  %s852_s30 = scalar_lea.vmem [#allocation7], %s1187_s14  ;;  %s1217_s2 = sld [smem:[#allocation3 + $0x13]] }
  0x33   :  { %v616_v47 = vld [vmem:[%s615_s16] sm:$0x1]  ;;  %v829_v49 = vadd.f32 %v828_v43, %v826_v45  ;;  %s1224_s6 = sld [smem:[#allocation3 + $0x1f]] }
  0x34   :  { %v539_v48 = vld [vmem:[%s538_s19] sm:$0x1]  ;;  %v620_v50 = vmul.f32 5.0, %v616_v47  ;;  %s669_s5 = scalar_lea.vmem [#allocation4], %s1202_s23  ;;  %s671_s10 = scalar_lea.vmem [#allocation7], %s1202_s23 }
  0x35   :  { %415 = vrot.lane.b32.xlu0 %v413_v35, %s1108_s9  ;;  %v643_v51 = vld [vmem:[%s642_s21] sm:$0x1]  ;;  %v543_v52 = vmul.f32 2.0, %v539_v48  ;;  %s746_s4 = scalar_lea.vmem [#allocation4], %s1204_s24  ;;  %s748_s8 = scalar_lea.vmem [#allocation7], %s1204_s24 }
  0x36   :  { %v618_v53 = vld [vmem:[%s617_s22] sm:$0x1]  ;;  %v647_v55 = vmul.f32 6.0, %v643_v51  ;;  %s773_s7 = scalar_lea.vmem [#allocation4], %s1208_s26  ;;  %s775_s11 = scalar_lea.vmem [#allocation7], %s1208_s26 }
  0x37   :  { %v541_v54 = vld [vmem:[%s540_s0] sm:$0x1]  ;;  %v621_v56 = vadd.f32 %v620_v50, %v618_v53  ;;  %s978_s21 = sld [smem:[#allocation3 + $0x8]] }
  0x38   :  { %519 = vrot.lane.b32.xlu1 %v517_v36, %s1108_s9  ;;  %v645_v57 = vld [vmem:[%s644_s25] sm:$0x1]  ;;  %v544_v58 = vadd.f32 %v543_v52, %v541_v54  ;;  %s565_s13 = scalar_lea.vmem [#allocation4], %s1217_s2  ;;  %s567_s14 = scalar_lea.vmem [#allocation7], %s1217_s2 }
  0x39   :  { %365 = vrot.lane.b32.xlu2 %v363_v44, %s1109_s12  ;;  %v851_v59 = vld [vmem:[%s850_s1] sm:$0x1]  ;;  %v648_v61 = vadd.f32 %v647_v55, %v645_v57  ;;  %s877_s15 = scalar_lea.vmem [#allocation4], %s1224_s6  ;;  %s879_s16 = scalar_lea.vmem [#allocation7], %s1224_s6 }
  0x3a   :  { %v435_v60 = vld [vmem:[%s434_s27] sm:$0x1]  ;;  %v855_v0 = vmul.f32 6.0, %v851_v59  ;;  %s990_s23 = sld [smem:[#allocation3 + $0x14]] }
  0x3b   :  { %v439_v62 = vmul.f32 6.0, %v435_v60  ;;  %v462_v63 = vld [vmem:[%s461_s28] sm:$0x1]  ;;  %s986_s24 = sld [smem:[#allocation3 + $0x10]] }
  0x3c   :  { %v437_v1 = vld [vmem:[%s436_s29] sm:$0x1]  ;;  %v466_v3 = vmul.f32 7.0, %v462_v63  ;;  %s998_s1 = sld [smem:[#allocation3 + $0x1c]] }
  0x3d   :  { %727 = vrot.lane.b32.xlu0 %v725_v46, %s1108_s9  ;;  %v853_v2 = vld [vmem:[%s852_s30] sm:$0x1]  ;;  %v440_v4 = vadd.f32 %v439_v62, %v437_v1  ;;  %s280_s25 = scalar_lea.vmem [#allocation4], %s978_s21  ;;  %s282_s26 = scalar_lea.vmem [#allocation7], %s978_s21 }
  0x3e   :  { %v856_v6 = vadd.f32 %v855_v0, %v853_v2  ;;  %v747_v7 = vld [vmem:[%s746_s4] sm:$0x1]  ;;  %s1244_s27 = sld [smem:[#allocation3 + $0x18]] }
  0x3f   :  { %v670_v8 = vld [vmem:[%s669_s5] sm:$0x1]  ;;  %v751_v10 = vmul.f32 2.0, %v747_v7 }
  0x40   :  { %831 = vrot.lane.b32.xlu1 %v829_v49, %s1108_s9  ;;  %v774_v11 = vld [vmem:[%s773_s7] sm:$0x1]  ;;  %v674_v12 = vmul.f32 7.0, %v670_v8  ;;  %s592_s28 = scalar_lea.vmem [#allocation4], %s990_s23  ;;  %s594_s29 = scalar_lea.vmem [#allocation7], %s990_s23 }
  0x41   :  { %623 = vrot.lane.b32.xlu2 %v621_v56, %s1108_s9  ;;  %s463_s9 = scalar_lea.vmem [#allocation7], %s1192_s18  ;;  %v749_v13 = vld [vmem:[%s748_s8] sm:$0x1]  ;;  %v778_v15 = vmul.f32 3.0, %v774_v11  ;;  %s54_s18 = sld [smem:[#allocation3]] }
  0x42   :  { %v464_v5 = vld [vmem:[%s463_s9] sm:$0x1]  ;;  %v752_v16 = vadd.f32 %v751_v10, %v749_v13  ;;  %s488_s30 = scalar_lea.vmem [#allocation4], %s986_s24  ;;  %s490_s2 = scalar_lea.vmem [#allocation7], %s986_s24 }
  0x43   :  { %v467_v9 = vadd.f32 %v466_v3, %v464_v5  ;;  %v672_v14 = vld [vmem:[%s671_s10] sm:$0x1]  ;;  %s800_s5 = scalar_lea.vmem [#allocation4], %s998_s1  ;;  %s802_s6 = scalar_lea.vmem [#allocation7], %s998_s1 }
  0x44   :  { %v776_v17 = vld [vmem:[%s775_s11] sm:$0x1]  ;;  %v675_v18 = vadd.f32 %v674_v12, %v672_v14  ;;  %s696_s7 = scalar_lea.vmem [#allocation4], %s1244_s27  ;;  %s698_s8 = scalar_lea.vmem [#allocation7], %s1244_s27 }
  0x45   :  { %546 = vrot.lane.b32.xlu0 %v544_v58, %s1110_s17  ;;  %v566_v19 = vld [vmem:[%s565_s13] sm:$0x1]  ;;  %v779_v20 = vadd.f32 %v778_v15, %v776_v17  ;;  %s1111_s10 = smov [#allocation9]  }
  0x46   :  { %v570_v21 = vmul.f32 3.0, %v566_v19  ;;  %v568_v22 = vld [vmem:[%s567_s14] sm:$0x1]  ;;  %s894_s11 = sshll.u32 %s1111_s10, 4  ;;  %s895_s11 = int_to_ptr.vmem [resolvable:$true] %s894_s11 }
  0x47   :  { %v878_v24 = vld [vmem:[%s877_s15] sm:$0x1]  ;;  %s68_s19 = scalar_lea.vmem [#allocation4], %s54_s18  ;;  %s70_s20 = scalar_lea.vmem [#allocation7], %s54_s18 }
  0x48   :  { %650 = vrot.lane.b32.xlu1 %v648_v61, %s1110_s17  ;;  %v571_v23 = vadd.f32 %v570_v21, %v568_v22  ;;  %v882_v25 = vmul.f32 7.0, %v878_v24  ;;  %v880_v26 = vld [vmem:[%s879_s16] sm:$0x1]  ;;  %s896_s15 = sshll.u32 %s1283_s3, 4  ;;  %s897_s15 = int_to_ptr.hbm [resolvable:$true] %s896_s15 }
  0x49   :  { %442 = vrot.lane.b32.xlu2 %v440_v4, %s1110_s17  ;;  %v69_v28 = vld [vmem:[%s68_s19] sm:$0x1] }
  0x4a   :  { %v883_v27 = vadd.f32 %v882_v25, %v880_v26  ;;  %v73_v29 = vmul.f32 0.0, %v69_v28  ;;  %v71_v30 = vld [vmem:[%s70_s20] sm:$0x1] }
  0x4b   :  { %v281_v36 = vld [vmem:[%s280_s25] sm:$0x1] }
  0x4c   :  { %v74_v31 = vadd.f32 %v73_v29, %v71_v30  ;;  %v283_v37 = vld [vmem:[%s282_s26] sm:$0x1]  ;;  %v285_v38 = vmul.f32 0.0, %v281_v36 }
  0x4d   :  { %858 = vrot.lane.b32.xlu0 %v856_v6, %s1110_s17  ;;  %v593_v40 = vld [vmem:[%s592_s28] sm:$0x1] }
  0x4e   :  { %76 = vst.msk [vmem:[#allocation9] sm:$0x1] %vm75_vm0, %v74_v31  ;;  %v286_v39 = vadd.f32 %v285_v38, %v283_v37  ;;  %v595_v41 = vld [vmem:[%s594_s29] sm:$0x1]  ;;  %v597_v43 = vmul.f32 4.0, %v593_v40 }
  0x4f   :  { %v489_v42 = vld [vmem:[%s488_s30] sm:$0x1] }
  0x50   :  { %469 = vrot.lane.b32.xlu1 %v467_v9, %s1109_s12  ;;  %287 = vst.msk [vmem:[#allocation9 + $0x2] sm:$0x1] %vm75_vm0, %v286_v39  ;;  %v491_v44 = vld [vmem:[%s490_s2] sm:$0x1]  ;;  %v493_v45 = vmul.f32 0.0, %v489_v42  ;;  %v598_v49 = vadd.f32 %v597_v43, %v595_v41 }
  0x51   :  { %754 = vrot.lane.b32.xlu2 %v752_v16, %s1110_s17  ;;  %s974_s17 = sld [smem:[#allocation3 + $0x4]]  ;;  %v801_v53 = vld [vmem:[%s800_s5] sm:$0x1] }
  0x52   :  { %v494_v50 = vadd.f32 %v493_v45, %v491_v44  ;;  %599 = vst.msk [vmem:[#allocation9 + $0x5] sm:$0x1] %vm75_vm0, %v598_v49  ;;  %v803_v54 = vld [vmem:[%s802_s6] sm:$0x1]  ;;  %v805_v55 = vmul.f32 4.0, %v801_v53 }
  0x53   :  { %v697_v56 = vld [vmem:[%s696_s7] sm:$0x1] }
  0x54   :  { %495 = vst.msk [vmem:[#allocation9 + $0x4] sm:$0x1] %vm75_vm0, %v494_v50  ;;  %v806_v58 = vadd.f32 %v805_v55, %v803_v54  ;;  %v701_v59 = vmul.f32 0.0, %v697_v56  ;;  %v699_v61 = vld [vmem:[%s698_s8] sm:$0x1] }
  0x55   :  { %677 = vrot.lane.b32.xlu0 %v675_v18, %s1109_s12 }
  0x56   :  { %v702_v62 = vadd.f32 %v701_v59, %v699_v61  ;;  %807 = vst.msk [vmem:[#allocation9 + $0x7] sm:$0x1] %vm75_vm0, %v806_v58 }
  0x57   :  { %s176_s22 = scalar_lea.vmem [#allocation4], %s974_s17  ;;  %s178_s0 = scalar_lea.vmem [#allocation7], %s974_s17 }
  0x58   :  { %781 = vrot.lane.b32.xlu1 %v779_v20, %s1109_s12  ;;  %v177_v32 = vld [vmem:[%s176_s22] sm:$0x1]  ;;  %703 = vst.msk [vmem:[#allocation9 + $0x6] sm:$0x1] %vm75_vm0, %v702_v62 }
  0x59   :  { %573 = vrot.lane.b32.xlu2 %v571_v23, %s1109_s12  ;;  %v181_v33 = vmul.f32 4.0, %v177_v32  ;;  %v179_v34 = vld [vmem:[%s178_s0] sm:$0x1] }
  0x5b   :  { %v182_v35 = vadd.f32 %v181_v33, %v179_v34 }
  0x5d   :  { %183 = vst.msk [vmem:[#allocation9 + $0x1] sm:$0x1] %vm75_vm0, %v182_v35 }
  0x61   :  { %885 = vrot.lane.b32.xlu2 %v883_v27, %s1109_s12  ;;  %s982_s12 = sld [smem:[#allocation3 + $0xc]] }
  0x67   :  { %s384_s9 = scalar_lea.vmem [#allocation4], %s982_s12  ;;  %s386_s4 = scalar_lea.vmem [#allocation7], %s982_s12 }
  0x68   :  { %v385_v46 = vld [vmem:[%s384_s9] sm:$0x1] }
  0x69   :  { %v389_v48 = vmul.f32 4.0, %v385_v46  ;;  %v387_v51 = vld [vmem:[%s386_s4] sm:$0x1] }
  0x6b   :  { %v390_v52 = vadd.f32 %v389_v48, %v387_v51 }
  0x6d   :  { %391 = vst.msk [vmem:[#allocation9 + $0x3] sm:$0x1] %vm75_vm0, %v390_v52 }
  0x83   :  { %v235_v47 = vpop.permute.xlu2 %234 }
  0x8b   :  { %v262_v57 = vpop.permute.xlu2 %261 }
  0x8f   :  { %v101_v60 = vpop.permute.xlu0 %100 }
  0x90   :  { %104 = vst.msk [vmem:[#allocation9] sm:$0x1] %vm103_vm1, %v101_v60 }
  0x92   :  { %v157_v63 = vpop.permute.xlu1 %156 }
  0x93   :  { %v366_v0 = vpop.permute.xlu2 %365 }
  0x97   :  { %v129_v1 = vpop.permute.xlu0 %128 }
  0x98   :  { %132 = vst.msk [vmem:[#allocation9] sm:$0x1] %vm131_vm2, %v129_v1 }
  0x99   :  { %160 = vst.msk [vmem:[#allocation9] sm:$0x1] %vm159_vm3, %v157_v63 }
  0x9a   :  { %v208_v2 = vpop.permute.xlu1 %207 }
  0x9b   :  { %210 = vst.msk [vmem:[#allocation9 + $0x1] sm:$0x1] %vm103_vm1, %v208_v2  ;;  %v624_v3 = vpop.permute.xlu2 %623 }
  0x9c   :  { %237 = vst.msk [vmem:[#allocation9 + $0x1] sm:$0x1] %vm131_vm2, %v235_v47 }
  0x9d   :  { %264 = vst.msk [vmem:[#allocation9 + $0x1] sm:$0x1] %vm159_vm3, %v262_v57 }
  0x9e   :  { %626 = vst.msk [vmem:[#allocation9 + $0x5] sm:$0x1] %vm103_vm1, %v624_v3 }
  0x9f   :  { %v312_v4 = vpop.permute.xlu0 %311 }
  0xa0   :  { %314 = vst.msk [vmem:[#allocation9 + $0x2] sm:$0x1] %vm103_vm1, %v312_v4 }
  0xa2   :  { %v339_v5 = vpop.permute.xlu1 %338 }
  0xa3   :  { %341 = vst.msk [vmem:[#allocation9 + $0x2] sm:$0x1] %vm131_vm2, %v339_v5  ;;  %v443_v6 = vpop.permute.xlu2 %442 }
  0xa4   :  { %368 = vst.msk [vmem:[#allocation9 + $0x2] sm:$0x1] %vm159_vm3, %v366_v0 }
  0xa7   :  { %v416_v7 = vpop.permute.xlu0 %415 }
  0xa8   :  { %418 = vst.msk [vmem:[#allocation9 + $0x3] sm:$0x1] %vm103_vm1, %v416_v7 }
  0xa9   :  { %445 = vst.msk [vmem:[#allocation9 + $0x3] sm:$0x1] %vm131_vm2, %v443_v6 }
  0xaa   :  { %v520_v8 = vpop.permute.xlu1 %519 }
  0xab   :  { %522 = vst.msk [vmem:[#allocation9 + $0x4] sm:$0x1] %vm103_vm1, %v520_v8  ;;  %v755_v9 = vpop.permute.xlu2 %754 }
  0xaf   :  { %v728_v10 = vpop.permute.xlu0 %727 }
  0xb0   :  { %730 = vst.msk [vmem:[#allocation9 + $0x6] sm:$0x1] %vm103_vm1, %v728_v10 }
  0xb1   :  { %757 = vst.msk [vmem:[#allocation9 + $0x6] sm:$0x1] %vm131_vm2, %v755_v9 }
  0xb2   :  { %v832_v11 = vpop.permute.xlu1 %831 }
  0xb3   :  { %834 = vst.msk [vmem:[#allocation9 + $0x7] sm:$0x1] %vm103_vm1, %v832_v11  ;;  %v574_v12 = vpop.permute.xlu2 %573 }
  0xb7   :  { %v547_v13 = vpop.permute.xlu0 %546 }
  0xb8   :  { %549 = vst.msk [vmem:[#allocation9 + $0x4] sm:$0x1] %vm131_vm2, %v547_v13 }
  0xb9   :  { %576 = vst.msk [vmem:[#allocation9 + $0x4] sm:$0x1] %vm159_vm3, %v574_v12 }
  0xba   :  { %v651_v14 = vpop.permute.xlu1 %650 }
  0xbb   :  { %653 = vst.msk [vmem:[#allocation9 + $0x5] sm:$0x1] %vm131_vm2, %v651_v14  ;;  %v886_v15 = vpop.permute.xlu2 %885 }
  0xbf   :  { %v859_v16 = vpop.permute.xlu0 %858 }
  0xc0   :  { %861 = vst.msk [vmem:[#allocation9 + $0x7] sm:$0x1] %vm131_vm2, %v859_v16 }
  0xc1   :  { %888 = vst.msk [vmem:[#allocation9 + $0x7] sm:$0x1] %vm159_vm3, %v886_v15 }
  0xc2   :  { %v470_v17 = vpop.permute.xlu1 %469 }
  0xc3   :  { %472 = vst.msk [vmem:[#allocation9 + $0x3] sm:$0x1] %vm159_vm3, %v470_v17 }
  0xc7   :  { %v678_v18 = vpop.permute.xlu0 %677 }
  0xc8   :  { %680 = vst.msk [vmem:[#allocation9 + $0x5] sm:$0x1] %vm159_vm3, %v678_v18 }
  0xca   :  { %v782_v19 = vpop.permute.xlu1 %781 }
  0xcb   :  { %784 = vst.msk [vmem:[#allocation9 + $0x6] sm:$0x1] %vm159_vm3, %v782_v19 }
  0xcc   :  { %899 = dma.vmem_to_hbm [thread:$0]  %s895_s11, 128, %s897_s15, [#allocation6]  }
  0xcd   :  { %1101 = dma.done.wait [#allocation6], 128  }
  0xce   :  { %1102 = vsyncadd [#allocation6], 4294967168 }
  0xcf   :  { %904 = vsyncpa [#allocation5], 1 }
  0xd0   :  { %905 = vsyncpa [#allocation8], 1 }
  0xd1   :  { %906 = vsyncpa [#allocation6], 1 }

</bundles_post_ra>
